<compile_context>
chip_gen: v6e
topology: v6e:2x2x1
jax: 0.10.0
libtpu: 0.0.40
codegen_flags: <defaults>
</compile_context>

<pallas_src>
import math
import functools

import jax
import jax.numpy as jnp
from jax.experimental import pallas as pl
from jax.experimental.pallas import tpu as pltpu

NEG_INF = -1e30
MXU_DTYPE = jnp.bfloat16   # HBM storage dtype for weights & activations
LN_EPS = 1e-5


# --------------------------- VMEM budget (per generation) --------------------

@functools.lru_cache(maxsize=None)
def _vmem_limit_bytes():
    """~75% of physical VMEM, capped at 100 MiB (96 MiB v5e/v6e, 48 MiB v7x)."""
    cap = 64 * 1024 * 1024
    try:
        fn = getattr(pltpu, "get_tpu_info", None)
        if fn is not None:
            info = fn()
            cap = int(getattr(info, "vmem_capacity_bytes", cap) or cap)
    except Exception:
        pass
    return int(min(cap * 3 // 4, 100 * 1024 * 1024))


# --------------------------- tiled fused linear ------------------------------

def _pick_tile(dim, target, align):
    """Largest tile <= target that is a multiple of `align` and divides `dim`,
    falling back to the full dimension (full-dim blocks are always legal).
    TODO(synk): pad M/N to 256-multiples instead of falling back to odd tiles."""
    if dim <= target:
        return dim
    for t in range(target, align - 1, -align):
        if dim % t == 0:
            return t
    return dim


def _linear_kernel(*refs, nk, relu, has_res, has_ln):
    x_ref, w_ref, b_ref = refs[0], refs[1], refs[2]
    idx = 3
    res_ref = g_ref = beta_ref = None
    if has_res:
        res_ref = refs[idx]; idx += 1
    if has_ln:
        g_ref = refs[idx]; beta_ref = refs[idx + 1]; idx += 2
    o_ref = refs[idx]
    acc_ref = refs[idx + 1]

    k = pl.program_id(2)

    @pl.when(k == 0)
    def _():
        acc_ref[...] = jnp.zeros_like(acc_ref)

    # x and w are already bf16 in VMEM -> no per-step cast work (v5e win).
    acc_ref[...] += jnp.dot(x_ref[...], w_ref[...],
                            preferred_element_type=jnp.float32)

    @pl.when(k == nk - 1)
    def _():
        out = acc_ref[...] + b_ref[...]
        if relu:
            out = jnp.maximum(out, 0.0)
        if has_res:
            out = out + res_ref[...].astype(jnp.float32)
        if has_ln:
            mu = jnp.mean(out, axis=-1, keepdims=True)
            var = jnp.mean((out - mu) ** 2, axis=-1, keepdims=True)
            out = (out - mu) * jax.lax.rsqrt(var + LN_EPS)
            out = out * g_ref[...] + beta_ref[...]
        o_ref[...] = out.astype(o_ref.dtype)


def linear(x, w, b, *, relu=False, residual=None, pe=None, ln=None,
           tm=256, tn=256, tk=256, out_dtype=MXU_DTYPE):
    """y = x @ w + b, with optional fused relu / residual / pos-encoding / LayerNorm.

    x: (M, K) bf16, w: (K, N) bf16, b: (1, N) f32.
    residual: (M, N) or None.  pe: (S, N) added with row index wrapping mod S.
    ln: (gamma, beta) each (1, N) or None.  Returns (M, N) out_dtype (default bf16).
    """
    M, K = x.shape
    N = w.shape[1]
    has_res = (residual is not None) or (pe is not None)
    has_ln = ln is not None

    if pe is not None:
        # bm divides S so a row-block never straddles two batch elements.
        bm = _pick_tile(pe.shape[0], tm, 8)
    else:
        bm = _pick_tile(M, tm, 8)
    bk = _pick_tile(K, tk, 128)
    # LayerNorm reduces over the full feature axis -> keep it in one tile.
    bn = N if has_ln else _pick_tile(N, tn, 128)
    nm, nn, nk = M // bm, N // bn, K // bk

    in_specs = [
        pl.BlockSpec((bm, bk), lambda i, j, k: (i, k)),
        pl.BlockSpec((bk, bn), lambda i, j, k: (k, j)),
        pl.BlockSpec((1, bn), lambda i, j, k: (0, j)),
    ]
    args = [x, w, b]
    if pe is not None:
        nsb = pe.shape[0] // bm
        in_specs.append(pl.BlockSpec((bm, bn), lambda i, j, k: (i % nsb, j)))
        args.append(pe)
    elif residual is not None:
        in_specs.append(pl.BlockSpec((bm, bn), lambda i, j, k: (i, j)))
        args.append(residual)
    if has_ln:
        gamma, beta = ln
        in_specs.append(pl.BlockSpec((1, bn), lambda i, j, k: (0, j)))
        in_specs.append(pl.BlockSpec((1, bn), lambda i, j, k: (0, j)))
        args.append(gamma)
        args.append(beta)

    kernel = functools.partial(_linear_kernel, nk=nk, relu=relu,
                               has_res=has_res, has_ln=has_ln)
    in_bytes = sum(int(a.size) * a.dtype.itemsize for a in args)
    out_bytes = M * N * jnp.dtype(out_dtype).itemsize
    cost = pl.CostEstimate(flops=2 * M * N * K, transcendentals=0,
                           bytes_accessed=int(in_bytes + out_bytes))

    return pl.pallas_call(
        kernel,
        out_shape=jax.ShapeDtypeStruct((M, N), out_dtype),
        grid=(nm, nn, nk),
        in_specs=in_specs,
        out_specs=pl.BlockSpec((bm, bn), lambda i, j, k: (i, j)),
        scratch_shapes=[pltpu.VMEM((bm, bn), jnp.float32)],
        compiler_params=pltpu.CompilerParams(
            dimension_semantics=("parallel", "parallel", "arbitrary"),
            vmem_limit_bytes=_vmem_limit_bytes()),
        cost_estimate=cost,
    )(*args)


# ----------------- fused multi-head attention block (per layer) --------------
# One kernel per attention sub-layer:  grid = (B, nhead).
#   q  = x   @ Wq_h  (+ bq_h, softmax scale pre-folded host-side)
#   kv = mem @ Wkv_h (+ bkv_h)             (mem == x for self-attention)
#   head = softmax(q k^T [+ causal mask]) v
#   acc += head @ Wo_h     (head axis is the reduction / "arbitrary" grid axis)
#   finalize: out = LayerNorm(acc + bo + x)       (post-LN residual block)

def _fused_mha_kernel(x_ref, mem_ref, w_ref, b_ref, wo_ref, bo_ref,
                      g_ref, beta_ref, o_ref, acc_ref, *, dh, causal):
    h = pl.program_id(1)
    nh = pl.num_programs(1)

    x = x_ref[...]                       # (S, d_model) bf16 -- also the residual
    mem = mem_ref[...]                   # (S, d_model) bf16
    w = w_ref[0]                         # (d_model, 3*dh) bf16, cols = [q | k | v]
    b = b_ref[0]                         # (1, 3*dh) f32

    q = (jnp.dot(x, w[:, :dh], preferred_element_type=jnp.float32)
         + b[:, :dh]).astype(MXU_DTYPE)
    kv = jnp.dot(mem, w[:, dh:], preferred_element_type=jnp.float32) + b[:, dh:]
    k = kv[:, :dh].astype(MXU_DTYPE)
    v = kv[:, dh:].astype(MXU_DTYPE)

    # q @ k^T via contracting dims (no explicit transpose); scale already in Wq.
    s = jax.lax.dot_general(q, k, (((1,), (1,)), ((), ())),
                            preferred_element_type=jnp.float32)
    if causal:
        S = s.shape[0]
        row = jax.lax.broadcasted_iota(jnp.int32, (S, S), 0)
        col = jax.lax.broadcasted_iota(jnp.int32, (S, S), 1)
        s = jnp.where(col > row, NEG_INF, s)
    s = s - jnp.max(s, axis=-1, keepdims=True)
    p = jnp.exp(s)
    p = p * pl.reciprocal(jnp.sum(p, axis=-1, keepdims=True), approx=True)
    head = jnp.dot(p.astype(MXU_DTYPE), v, preferred_element_type=jnp.float32)

    @pl.when(h == 0)
    def _():
        acc_ref[...] = jnp.zeros_like(acc_ref)

    # Per-head contribution of the output projection (sum over heads == concat@Wo).
    acc_ref[...] += jnp.dot(head.astype(MXU_DTYPE), wo_ref[0],
                            preferred_element_type=jnp.float32)

    @pl.when(h == nh - 1)
    def _():
        out = acc_ref[...] + bo_ref[...] + x.astype(jnp.float32)
        mu = jnp.mean(out, axis=-1, keepdims=True)
        var = jnp.mean((out - mu) ** 2, axis=-1, keepdims=True)
        out = (out - mu) * jax.lax.rsqrt(var + LN_EPS)
        out = out * g_ref[...] + beta_ref[...]
        o_ref[...] = out.astype(o_ref.dtype)


def fused_mha(x, mem, w_qkv_hm, b_qkv_hm, w_o_hm, b_o, gamma, beta, *,
              B, S, d_model, nhead, causal):
    """x/mem: (B*S, d_model) bf16; head-major weight slabs (see prepare_params).
    Returns LayerNorm(x + MHA(x, mem, mem) @ Wo + bo) as (B*S, d_model) bf16."""
    dh = d_model // nhead
    kernel = functools.partial(_fused_mha_kernel, dh=dh, causal=causal)
    cost = pl.CostEstimate(
        flops=(2 * B * S * d_model * 3 * d_model      # per-head QKV projections
               + 4 * B * S * S * d_model              # scores + PV
               + 2 * B * S * d_model * d_model),      # output projection
        transcendentals=B * nhead * S * S,
        bytes_accessed=int(2 * (3 * B * S * d_model + 4 * d_model * d_model)
                           + 4 * 5 * d_model))
    return pl.pallas_call(
        kernel,
        out_shape=jax.ShapeDtypeStruct((B * S, d_model), MXU_DTYPE),
        grid=(B, nhead),
        in_specs=[
            pl.BlockSpec((S, d_model), lambda b, hh: (b, 0)),          # x / residual
            pl.BlockSpec((S, d_model), lambda b, hh: (b, 0)),          # kv source
            pl.BlockSpec((1, d_model, 3 * dh), lambda b, hh: (hh, 0, 0)),
            pl.BlockSpec((1, 1, 3 * dh), lambda b, hh: (hh, 0, 0)),
            pl.BlockSpec((1, dh, d_model), lambda b, hh: (hh, 0, 0)),
            pl.BlockSpec((1, d_model), lambda b, hh: (0, 0)),          # bo
            pl.BlockSpec((1, d_model), lambda b, hh: (0, 0)),          # gamma
            pl.BlockSpec((1, d_model), lambda b, hh: (0, 0)),          # beta
        ],
        out_specs=pl.BlockSpec((S, d_model), lambda b, hh: (b, 0)),
        scratch_shapes=[pltpu.VMEM((S, d_model), jnp.float32)],
        compiler_params=pltpu.CompilerParams(
            dimension_semantics=("parallel", "arbitrary"),
            vmem_limit_bytes=_vmem_limit_bytes()),
        cost_estimate=cost,
    )(x, mem, w_qkv_hm, b_qkv_hm, w_o_hm, b_o, gamma, beta)


# ------------------------------ model pieces ---------------------------------

def positional_encoding(seq_len, d_model):
    pos = jnp.arange(seq_len, dtype=jnp.float32)[:, None]
    div = jnp.exp(jnp.arange(0, d_model, 2, dtype=jnp.float32)
                  * (-math.log(10000.0) / d_model))
    sin = jnp.sin(pos * div)
    cos = jnp.cos(pos * div)
    pe = jnp.zeros((seq_len, d_model), jnp.float32)
    pe = pe.at[:, 0::2].set(sin)
    pe = pe.at[:, 1::2].set(cos[:, : d_model // 2])
    return pe


def decoder_forward(x, params, *, d_model, nhead, num_layers):
    """x: (batch, seq, input_dim) f32 -> (batch, seq, input_dim) f32."""
    B, S, input_dim = x.shape
    xf = x.reshape(B * S, input_dim).astype(MXU_DTYPE)      # batch-major tokens

    pe = positional_encoding(S, d_model)                    # (S, d_model) f32
    # Input projection with the PE add fused into the epilogue; the (S, d_model)
    # table is indexed modulo S by the BlockSpec -> never tiled to (B*S, d_model).
    if S % 8 == 0 or B == 1:
        h = linear(xf, params["in_w"], params["in_b"], pe=pe)
    else:
        h = linear(xf, params["in_w"], params["in_b"],
                   residual=jnp.tile(pe, (B, 1)))

    memory = h   # nn.TransformerDecoder reuses the same memory for every layer.

    for lp in params["layers"]:
        # self-attention block (causal), fully fused incl. out-proj + residual + LN1
        h = fused_mha(h, h, lp["sa_w"], lp["sa_b"], lp["sa_wo"], lp["sa_bo"],
                      lp["ln1_g"], lp["ln1_b"],
                      B=B, S=S, d_model=d_model, nhead=nhead, causal=True)
        # cross-attention block (memory = pos-encoded input, no mask) + LN2
        h = fused_mha(h, memory, lp["ca_w"], lp["ca_b"], lp["ca_wo"], lp["ca_bo"],
                      lp["ln2_g"], lp["ln2_b"],
                      B=B, S=S, d_model=d_model, nhead=nhead, causal=False)
        # feed-forward block, second matmul fused with residual + LN3
        ff = linear(h, lp["ff1_w"], lp["ff1_b"], relu=True)
        h = linear(ff, lp["ff2_w"], lp["ff2_b"], residual=h,
                   ln=(lp["ln3_g"], lp["ln3_b"]))

    out = linear(h, params["out_w"], params["out_b"], out_dtype=jnp.float32)
    return out.reshape(B, S, input_dim)


# ------------------------------- param init ----------------------------------

def init_params(key, *, d_model, nhead, num_layers, input_dim):
    """Standard-layout float32 parameters (mirrors the PyTorch module)."""
    dff = 4 * d_model

    def dense(k, fan_in, fan_out):
        kw, kb = jax.random.split(k)
        w = jax.random.normal(kw, (fan_in, fan_out), jnp.float32) * 0.05
        b = jax.random.normal(kb, (fan_out,), jnp.float32) * 0.05
        return w, b

    def attn(k):
        kq, kk, kv, ko = jax.random.split(k, 4)
        wq, bq = dense(kq, d_model, d_model)
        wk, bk = dense(kk, d_model, d_model)
        wv, bv = dense(kv, d_model, d_model)
        wo, bo = dense(ko, d_model, d_model)
        return dict(wq=wq, bq=bq, wk=wk, bk=bk, wv=wv, bv=bv, wo=wo, bo=bo)

    keys = jax.random.split(key, 2 + num_layers)
    in_w, in_b = dense(keys[0], input_dim, d_model)
    out_w, out_b = dense(keys[1], d_model, input_dim)

    layers = []
    for li in range(num_layers):
        lk = jax.random.split(keys[2 + li], 4)
        ff1_w, ff1_b = dense(lk[2], d_model, dff)
        ff2_w, ff2_b = dense(lk[3], dff, d_model)
        layers.append(dict(
            self_attn=attn(lk[0]), cross_attn=attn(lk[1]),
            ff1_w=ff1_w, ff1_b=ff1_b, ff2_w=ff2_w, ff2_b=ff2_b,
            ln1_g=jnp.ones((d_model,)), ln1_b=jnp.zeros((d_model,)),
            ln2_g=jnp.ones((d_model,)), ln2_b=jnp.zeros((d_model,)),
            ln3_g=jnp.ones((d_model,)), ln3_b=jnp.zeros((d_model,)),
        ))
    return dict(in_w=in_w, in_b=in_b, out_w=out_w, out_b=out_b, layers=layers)


def prepare_params(params, *, d_model, nhead):
    """One-time host-side prep: bf16 weights, head-major QKV slabs with the
    softmax scale folded into Wq/bq, row vectors for biases / LN params."""
    assert d_model % nhead == 0
    dh = d_model // nhead
    scale = 1.0 / math.sqrt(dh)

    def row(v):
        return jnp.asarray(v, jnp.float32).reshape(1, -1)

    def w_hm(m):   # (d_model, d_model) -> (nhead, d_model, dh)
        return m.reshape(d_model, nhead, dh).transpose(1, 0, 2)

    def b_hm(v):   # (d_model,) -> (nhead, 1, dh)
        return v.reshape(nhead, 1, dh)

    def pack_attn(a):
        wq, bq = a["wq"] * scale, a["bq"] * scale       # fold softmax scale
        w = jnp.concatenate([w_hm(wq), w_hm(a["wk"]), w_hm(a["wv"])],
                            axis=-1).astype(MXU_DTYPE)  # (nhead, d_model, 3*dh)
        b = jnp.concatenate([b_hm(bq), b_hm(a["bk"]), b_hm(a["bv"])],
                            axis=-1).astype(jnp.float32)  # (nhead, 1, 3*dh)
        wo = a["wo"].reshape(nhead, dh, d_model).astype(MXU_DTYPE)
        return w, b, wo, row(a["bo"])

    out = dict(in_w=params["in_w"].astype(MXU_DTYPE), in_b=row(params["in_b"]),
               out_w=params["out_w"].astype(MXU_DTYPE), out_b=row(params["out_b"]),
               layers=[])
    for lp in params["layers"]:
        sa_w, sa_b, sa_wo, sa_bo = pack_attn(lp["self_attn"])
        ca_w, ca_b, ca_wo, ca_bo = pack_attn(lp["cross_attn"])
        out["layers"].append(dict(
            sa_w=sa_w, sa_b=sa_b, sa_wo=sa_wo, sa_bo=sa_bo,
            ca_w=ca_w, ca_b=ca_b, ca_wo=ca_wo, ca_bo=ca_bo,
            ff1_w=lp["ff1_w"].astype(MXU_DTYPE), ff1_b=row(lp["ff1_b"]),
            ff2_w=lp["ff2_w"].astype(MXU_DTYPE), ff2_b=row(lp["ff2_b"]),
            ln1_g=row(lp["ln1_g"]), ln1_b=row(lp["ln1_b"]),
            ln2_g=row(lp["ln2_g"]), ln2_b=row(lp["ln2_b"]),
            ln3_g=row(lp["ln3_g"]), ln3_b=row(lp["ln3_b"]),
        ))
    return out


# ---------------------------------- main --------------------------------------

if __name__ == "__main__":
    # Small shapes consistent with forward: (batch, seq, input_dim)
    batch, seq, input_dim = 2, 8, 16
    d_model, nhead, num_layers = 32, 4, 2

    key = jax.random.PRNGKey(0)
    kx, kp = jax.random.split(key)
    x = jax.random.normal(kx, (batch, seq, input_dim), jnp.float32)
    params = init_params(kp, d_model=d_model, nhead=nhead,
                         num_layers=num_layers, input_dim=input_dim)
    kparams = prepare_params(params, d_model=d_model, nhead=nhead)

    fwd = jax.jit(functools.partial(decoder_forward, d_model=d_model,
                                    nhead=nhead, num_layers=num_layers))
    out = fwd(x, kparams)
    jax.block_until_ready(out)
    assert out.shape == (batch, seq, input_dim)
    assert bool(jnp.all(jnp.isfinite(out)))
    print("KERNEL_OK")
</pallas_src>

<mosaic_0001>
module attributes {stable_mosaic.version = 11 : i64} {
  func.func @_linear_kernel(%arg0: i32, %arg1: i32, %arg2: i32, %arg3: memref<8x16xbf16, #tpu.memory_space<vmem>>, %arg4: memref<16x32xbf16, #tpu.memory_space<vmem>>, %arg5: memref<1x32xf32, #tpu.memory_space<vmem>>, %arg6: memref<8x32xf32, #tpu.memory_space<vmem>>, %arg7: memref<8x32xbf16, #tpu.memory_space<vmem>>, %arg8: memref<8x32xf32, #tpu.memory_space<vmem>>) attributes {dimension_semantics = [#tpu.dimension_semantics<parallel>, #tpu.dimension_semantics<parallel>, #tpu.dimension_semantics<arbitrary>], iteration_bounds = array<i64: 2, 1, 1>, scalar_prefetch = 0 : i64, scratch_operands = 1 : i64, tpu.core_type = #tpu.core_type<tc>, window_params = [{transform_indices = @transform_0, window_bounds = array<i64: 8, 16>}, {transform_indices = @transform_1, window_bounds = array<i64: 16, 32>}, {transform_indices = @transform_2, window_bounds = array<i64: 1, 32>}, {transform_indices = @transform_3, window_bounds = array<i64: 8, 32>}, {transform_indices = @transform_4, window_bounds = array<i64: 8, 32>}]} {
    %c0_i32 = arith.constant 0 : i32
    %0 = arith.cmpi eq, %arg2, %c0_i32 : i32
    %1 = arith.extui %0 : i1 to i32
    %c0_i32_0 = arith.constant 0 : i32
    %2 = arith.cmpi ne, %1, %c0_i32_0 : i32
    scf.if %2 {
      %cst_10 = arith.constant 0.000000e+00 : f32
      %12 = vector.broadcast %cst_10 : f32 to vector<8x32xf32>
      %c0_11 = arith.constant 0 : index
      %c0_12 = arith.constant 0 : index
      %13 = vector.load %arg8[%c0_11, %c0_12] : memref<8x32xf32, #tpu.memory_space<vmem>>, vector<8x32xf32>
      tpu.vector_store %arg8[%c0_11, %c0_12], %12 {strides = array<i32>} : memref<8x32xf32, #tpu.memory_space<vmem>>, vector<8x32xf32>,
    } else {
    }
    %c0 = arith.constant 0 : index
    %c0_1 = arith.constant 0 : index
    %3 = vector.load %arg8[%c0, %c0_1] : memref<8x32xf32, #tpu.memory_space<vmem>>, vector<8x32xf32>
    %c0_2 = arith.constant 0 : index
    %c0_3 = arith.constant 0 : index
    %4 = vector.load %arg3[%c0_2, %c0_3] : memref<8x16xbf16, #tpu.memory_space<vmem>>, vector<8x16xbf16>
    %c0_4 = arith.constant 0 : index
    %c0_5 = arith.constant 0 : index
    %5 = vector.load %arg4[%c0_4, %c0_5] : memref<16x32xbf16, #tpu.memory_space<vmem>>, vector<16x32xbf16>
    %cst = arith.constant dense<0.000000e+00> : vector<8x32xf32>
    %6 = tpu.matmul %4, %5, %cst {dimension_numbers = #tpu.dot_dimension_numbers<[1], [0], [0], [1], [0, 0, 1, 1], [], []>} : vector<8x16xbf16>, vector<16x32xbf16>, vector<8x32xf32> -> vector<8x32xf32>
    %7 = arith.addf %3, %6 : vector<8x32xf32>
    %c0_6 = arith.constant 0 : index
    %c0_7 = arith.constant 0 : index
    %8 = vector.load %arg8[%c0_6, %c0_7] : memref<8x32xf32, #tpu.memory_space<vmem>>, vector<8x32xf32>
    tpu.vector_store %arg8[%c0_6, %c0_7], %7 {strides = array<i32>} : memref<8x32xf32, #tpu.memory_space<vmem>>, vector<8x32xf32>,
    %c0_i32_8 = arith.constant 0 : i32
    %9 = arith.cmpi eq, %arg2, %c0_i32_8 : i32
    %10 = arith.extui %9 : i1 to i32
    %c0_i32_9 = arith.constant 0 : i32
    %11 = arith.cmpi ne, %10, %c0_i32_9 : i32
    scf.if %11 {
      %c0_10 = arith.constant 0 : index
      %c0_11 = arith.constant 0 : index
      %12 = vector.load %arg8[%c0_10, %c0_11] : memref<8x32xf32, #tpu.memory_space<vmem>>, vector<8x32xf32>
      %c0_12 = arith.constant 0 : index
      %c0_13 = arith.constant 0 : index
      %13 = vector.load %arg5[%c0_12, %c0_13] : memref<1x32xf32, #tpu.memory_space<vmem>>, vector<1x32xf32>
      %14 = vector.broadcast %13 : vector<1x32xf32> to vector<8x32xf32>
      %15 = arith.addf %12, %14 : vector<8x32xf32>
      %c0_14 = arith.constant 0 : index
      %c0_15 = arith.constant 0 : index
      %16 = vector.load %arg6[%c0_14, %c0_15] : memref<8x32xf32, #tpu.memory_space<vmem>>, vector<8x32xf32>
      %17 = arith.addf %15, %16 : vector<8x32xf32>
      %18 = arith.truncf %17 : vector<8x32xf32> to vector<8x32xbf16>
      %c0_16 = arith.constant 0 : index
      %c0_17 = arith.constant 0 : index
      %19 = vector.load %arg7[%c0_16, %c0_17] : memref<8x32xbf16, #tpu.memory_space<vmem>>, vector<8x32xbf16>
      tpu.vector_store %arg7[%c0_16, %c0_17], %18 {strides = array<i32>} : memref<8x32xbf16, #tpu.memory_space<vmem>>, vector<8x32xbf16>,
    } else {
    }
    return
  }
  func.func @transform_0(%arg0: i32, %arg1: i32, %arg2: i32) -> (i32, i32) {
    %c0_i32 = arith.constant 0 : i32
    return %arg0, %arg2 : i32, i32
  }
  func.func @transform_1(%arg0: i32, %arg1: i32, %arg2: i32) -> (i32, i32) {
    %c0_i32 = arith.constant 0 : i32
    return %arg2, %arg1 : i32, i32
  }
  func.func @transform_2(%arg0: i32, %arg1: i32, %arg2: i32) -> (i32, i32) {
    %c0_i32 = arith.constant 0 : i32
    %c0_i32_0 = arith.constant 0 : i32
    return %c0_i32, %arg1 : i32, i32
  }
  func.func @transform_3(%arg0: i32, %arg1: i32, %arg2: i32) -> (i32, i32) {
    %c1_i32 = arith.constant 1 : i32
    %c0_i32 = arith.constant 0 : i32
    %0 = arith.cmpi eq, %c1_i32, %c0_i32 : i32
    %c1_i32_0 = arith.constant 1 : i32
    %1 = arith.select %0, %c1_i32_0, %c1_i32 : i32
    %2 = arith.remsi %arg0, %1 : i32
    %c0_i32_1 = arith.constant 0 : i32
    %3 = arith.cmpi ne, %2, %c0_i32_1 : i32
    %c0_i32_2 = arith.constant 0 : i32
    %4 = arith.cmpi slt, %2, %c0_i32_2 : i32
    %c0_i32_3 = arith.constant 0 : i32
    %5 = arith.cmpi slt, %1, %c0_i32_3 : i32
    %6 = arith.xori %4, %5 : i1
    %7 = arith.andi %6, %3 : i1
    %8 = arith.addi %2, %1 : i32
    %9 = arith.select %7, %8, %2 : i32
    %c0_i32_4 = arith.constant 0 : i32
    return %9, %arg1 : i32, i32
  }
  func.func @transform_4(%arg0: i32, %arg1: i32, %arg2: i32) -> (i32, i32) {
    %c0_i32 = arith.constant 0 : i32
    return %arg0, %arg1 : i32, i32
  }
}

module attributes {stable_mosaic.version = 11 : i64} {
  func.func @_fused_mha_kernel(%arg0: i32, %arg1: i32, %arg2: memref<8x32xbf16, #tpu.memory_space<vmem>>, %arg3: memref<8x32xbf16, #tpu.memory_space<vmem>>, %arg4: memref<1x32x24xbf16, #tpu.memory_space<vmem>>, %arg5: memref<1x1x24xf32, #tpu.memory_space<vmem>>, %arg6: memref<1x8x32xbf16, #tpu.memory_space<vmem>>, %arg7: memref<1x32xf32, #tpu.memory_space<vmem>>, %arg8: memref<1x32xf32, #tpu.memory_space<vmem>>, %arg9: memref<1x32xf32, #tpu.memory_space<vmem>>, %arg10: memref<8x32xbf16, #tpu.memory_space<vmem>>, %arg11: memref<8x32xf32, #tpu.memory_space<vmem>>) attributes {dimension_semantics = [#tpu.dimension_semantics<parallel>, #tpu.dimension_semantics<arbitrary>], iteration_bounds = array<i64: 2, 4>, scalar_prefetch = 0 : i64, scratch_operands = 1 : i64, tpu.core_type = #tpu.core_type<tc>, window_params = [{transform_indices = @transform_0, window_bounds = array<i64: 8, 32>}, {transform_indices = @transform_1, window_bounds = array<i64: 8, 32>}, {transform_indices = @transform_2, window_bounds = array<i64: 1, 32, 24>}, {transform_indices = @transform_3, window_bounds = array<i64: 1, 1, 24>}, {transform_indices = @transform_4, window_bounds = array<i64: 1, 8, 32>}, {pipeline_mode = #tpu.pipeline_mode<synchronous>, transform_indices = @transform_5, window_bounds = array<i64: 1, 32>}, {pipeline_mode = #tpu.pipeline_mode<synchronous>, transform_indices = @transform_6, window_bounds = array<i64: 1, 32>}, {pipeline_mode = #tpu.pipeline_mode<synchronous>, transform_indices = @transform_7, window_bounds = array<i64: 1, 32>}, {transform_indices = @transform_8, window_bounds = array<i64: 8, 32>}]} {
    %c0 = arith.constant 0 : index
    %c0_0 = arith.constant 0 : index
    %0 = vector.load %arg2[%c0, %c0_0] : memref<8x32xbf16, #tpu.memory_space<vmem>>, vector<8x32xbf16>
    %c0_1 = arith.constant 0 : index
    %c0_2 = arith.constant 0 : index
    %1 = vector.load %arg3[%c0_1, %c0_2] : memref<8x32xbf16, #tpu.memory_space<vmem>>, vector<8x32xbf16>
    %c0_3 = arith.constant 0 : index
    %c0_4 = arith.constant 0 : index
    %c0_5 = arith.constant 0 : index
    %2 = vector.load %arg4[%c0_3, %c0_4, %c0_5] : memref<1x32x24xbf16, #tpu.memory_space<vmem>>, vector<1x32x24xbf16>
    %3 = vector.shape_cast %2 : vector<1x32x24xbf16> to vector<32x24xbf16>
    %c0_6 = arith.constant 0 : index
    %c0_7 = arith.constant 0 : index
    %c0_8 = arith.constant 0 : index
    %4 = vector.load %arg5[%c0_6, %c0_7, %c0_8] : memref<1x1x24xf32, #tpu.memory_space<vmem>>, vector<1x1x24xf32>
    %5 = vector.shape_cast %4 : vector<1x1x24xf32> to vector<1x24xf32>
    %6 = vector.extract_strided_slice %3 {offsets = [0, 0], sizes = [32, 8], strides = [1, 1]} : vector<32x24xbf16> to vector<32x8xbf16>
    %cst = arith.constant dense<0.000000e+00> : vector<8x8xf32>
    %7 = tpu.matmul %0, %6, %cst {dimension_numbers = #tpu.dot_dimension_numbers<[1], [0], [0], [1], [0, 0, 1, 1], [], []>} : vector<8x32xbf16>, vector<32x8xbf16>, vector<8x8xf32> -> vector<8x8xf32>
    %8 = vector.extract_strided_slice %5 {offsets = [0, 0], sizes = [1, 8], strides = [1, 1]} : vector<1x24xf32> to vector<1x8xf32>
    %9 = vector.broadcast %8 : vector<1x8xf32> to vector<8x8xf32>
    %10 = arith.addf %7, %9 : vector<8x8xf32>
    %11 = arith.truncf %10 : vector<8x8xf32> to vector<8x8xbf16>
    %12 = vector.extract_strided_slice %3 {offsets = [0, 8], sizes = [32, 16], strides = [1, 1]} : vector<32x24xbf16> to vector<32x16xbf16>
    %cst_9 = arith.constant dense<0.000000e+00> : vector<8x16xf32>
    %13 = tpu.matmul %1, %12, %cst_9 {dimension_numbers = #tpu.dot_dimension_numbers<[1], [0], [0], [1], [0, 0, 1, 1], [], []>} : vector<8x32xbf16>, vector<32x16xbf16>, vector<8x16xf32> -> vector<8x16xf32>
    %14 = vector.extract_strided_slice %5 {offsets = [0, 8], sizes = [1, 16], strides = [1, 1]} : vector<1x24xf32> to vector<1x16xf32>
    %15 = vector.broadcast %14 : vector<1x16xf32> to vector<8x16xf32>
    %16 = arith.addf %13, %15 : vector<8x16xf32>
    %17 = vector.extract_strided_slice %16 {offsets = [0, 0], sizes = [8, 8], strides = [1, 1]} : vector<8x16xf32> to vector<8x8xf32>
    %18 = arith.truncf %17 : vector<8x8xf32> to vector<8x8xbf16>
    %19 = vector.extract_strided_slice %16 {offsets = [0, 8], sizes = [8, 8], strides = [1, 1]} : vector<8x16xf32> to vector<8x8xf32>
    %20 = arith.truncf %19 : vector<8x8xf32> to vector<8x8xbf16>
    %cst_10 = arith.constant dense<0.000000e+00> : vector<8x8xf32>
    %21 = tpu.matmul %11, %18, %cst_10 {dimension_numbers = #tpu.dot_dimension_numbers<[1], [1], [0], [0], [0, 0, 1, 0], [], []>} : vector<8x8xbf16>, vector<8x8xbf16>, vector<8x8xf32> -> vector<8x8xf32>
    %22 = tpu.iota {dimensions = array<i32: 0>} : vector<8x8xi32>
    %23 = tpu.iota {dimensions = array<i32: 1>} : vector<8x8xi32>
    %24 = arith.cmpi sgt, %23, %22 : vector<8x8xi32>
    %cst_11 = arith.constant -1.000000e+30 : f32
    %25 = vector.broadcast %cst_11 : f32 to vector<8x8xf32>
    %26 = arith.select %24, %25, %21 : vector<8x8xi1>, vector<8x8xf32>
    %cst_12 = arith.constant dense<0xFF800000> : vector<8xf32>
    %27 = vector.multi_reduction <maximumf>, %26, %cst_12 [1] : vector<8x8xf32> to vector<8xf32>
    %28 = vector.shape_cast %27 : vector<8xf32> to vector<8x1xf32>
    %29 = vector.broadcast %28 : vector<8x1xf32> to vector<8x8xf32>
    %30 = arith.subf %26, %29 : vector<8x8xf32>
    %31 = math.exp %30 : vector<8x8xf32>
    %cst_13 = arith.constant dense<0.000000e+00> : vector<8xf32>
    %32 = vector.multi_reduction <add>, %31, %cst_13 [1] : vector<8x8xf32> to vector<8xf32>
    %33 = vector.shape_cast %32 : vector<8xf32> to vector<8x1xf32>
    %34 = tpu.reciprocal %33 {approx = true} : vector<8x1xf32> -> vector<8x1xf32>
    %35 = vector.broadcast %34 : vector<8x1xf32> to vector<8x8xf32>
    %36 = arith.mulf %31, %35 : vector<8x8xf32>
    %37 = arith.truncf %36 : vector<8x8xf32> to vector<8x8xbf16>
    %cst_14 = arith.constant dense<0.000000e+00> : vector<8x8xf32>
    %38 = tpu.matmul %37, %20, %cst_14 {dimension_numbers = #tpu.dot_dimension_numbers<[1], [0], [0], [1], [0, 0, 1, 1], [], []>} : vector<8x8xbf16>, vector<8x8xbf16>, vector<8x8xf32> -> vector<8x8xf32>
    %c0_i32 = arith.constant 0 : i32
    %39 = arith.cmpi eq, %arg1, %c0_i32 : i32
    %40 = arith.extui %39 : i1 to i32
    %c0_i32_15 = arith.constant 0 : i32
    %41 = arith.cmpi ne, %40, %c0_i32_15 : i32
    scf.if %41 {
      %cst_25 = arith.constant 0.000000e+00 : f32
      %52 = vector.broadcast %cst_25 : f32 to vector<8x32xf32>
      %c0_26 = arith.constant 0 : index
      %c0_27 = arith.constant 0 : index
      %53 = vector.load %arg11[%c0_26, %c0_27] : memref<8x32xf32, #tpu.memory_space<vmem>>, vector<8x32xf32>
      tpu.vector_store %arg11[%c0_26, %c0_27], %52 {strides = array<i32>} : memref<8x32xf32, #tpu.memory_space<vmem>>, vector<8x32xf32>,
    } else {
    }
    %c0_16 = arith.constant 0 : index
    %c0_17 = arith.constant 0 : index
    %42 = vector.load %arg11[%c0_16, %c0_17] : memref<8x32xf32, #tpu.memory_space<vmem>>, vector<8x32xf32>
    %43 = arith.truncf %38 : vector<8x8xf32> to vector<8x8xbf16>
    %c0_18 = arith.constant 0 : index
    %c0_19 = arith.constant 0 : index
    %c0_20 = arith.constant 0 : index
    %44 = vector.load %arg6[%c0_18, %c0_19, %c0_20] : memref<1x8x32xbf16, #tpu.memory_space<vmem>>, vector<1x8x32xbf16>
    %45 = vector.shape_cast %44 : vector<1x8x32xbf16> to vector<8x32xbf16>
    %cst_21 = arith.constant dense<0.000000e+00> : vector<8x32xf32>
    %46 = tpu.matmul %43, %45, %cst_21 {dimension_numbers = #tpu.dot_dimension_numbers<[1], [0], [0], [1], [0, 0, 1, 1], [], []>} : vector<8x8xbf16>, vector<8x32xbf16>, vector<8x32xf32> -> vector<8x32xf32>
    %47 = arith.addf %42, %46 : vector<8x32xf32>
    %c0_22 = arith.constant 0 : index
    %c0_23 = arith.constant 0 : index
    %48 = vector.load %arg11[%c0_22, %c0_23] : memref<8x32xf32, #tpu.memory_space<vmem>>, vector<8x32xf32>
    tpu.vector_store %arg11[%c0_22, %c0_23], %47 {strides = array<i32>} : memref<8x32xf32, #tpu.memory_space<vmem>>, vector<8x32xf32>,
    %c3_i32 = arith.constant 3 : i32
    %49 = arith.cmpi eq, %arg1, %c3_i32 : i32
    %50 = arith.extui %49 : i1 to i32
    %c0_i32_24 = arith.constant 0 : i32
    %51 = arith.cmpi ne, %50, %c0_i32_24 : i32
    scf.if %51 {
      %c0_25 = arith.constant 0 : index
      %c0_26 = arith.constant 0 : index
      %52 = vector.load %arg11[%c0_25, %c0_26] : memref<8x32xf32, #tpu.memory_space<vmem>>, vector<8x32xf32>
      %c0_27 = arith.constant 0 : index
      %c0_28 = arith.constant 0 : index
      %53 = vector.load %arg7[%c0_27, %c0_28] : memref<1x32xf32, #tpu.memory_space<vmem>>, vector<1x32xf32>
      %54 = vector.broadcast %53 : vector<1x32xf32> to vector<8x32xf32>
      %55 = arith.addf %52, %54 : vector<8x32xf32>
      %56 = arith.extf %0 : vector<8x32xbf16> to vector<8x32xf32>
      %57 = arith.addf %55, %56 : vector<8x32xf32>
      %cst_29 = arith.constant dense<0.000000e+00> : vector<8xf32>
      %58 = vector.multi_reduction <add>, %57, %cst_29 [1] : vector<8x32xf32> to vector<8xf32>
      %59 = vector.shape_cast %58 : vector<8xf32> to vector<8x1xf32>
      %cst_30 = arith.constant 3.200000e+01 : f32
      %60 = vector.broadcast %cst_30 : f32 to vector<8x1xf32>
      %61 = arith.divf %59, %60 : vector<8x1xf32>
      %62 = vector.broadcast %61 : vector<8x1xf32> to vector<8x32xf32>
      %63 = arith.subf %57, %62 : vector<8x32xf32>
      %64 = arith.mulf %63, %63 : vector<8x32xf32>
      %cst_31 = arith.constant dense<0.000000e+00> : vector<8xf32>
      %65 = vector.multi_reduction <add>, %64, %cst_31 [1] : vector<8x32xf32> to vector<8xf32>
      %66 = vector.shape_cast %65 : vector<8xf32> to vector<8x1xf32>
      %cst_32 = arith.constant 3.200000e+01 : f32
      %67 = vector.broadcast %cst_32 : f32 to vector<8x1xf32>
      %68 = arith.divf %66, %67 : vector<8x1xf32>
      %69 = vector.broadcast %61 : vector<8x1xf32> to vector<8x32xf32>
      %70 = arith.subf %57, %69 : vector<8x32xf32>
      %cst_33 = arith.constant 9.99999974E-6 : f32
      %71 = vector.broadcast %cst_33 : f32 to vector<8x1xf32>
      %72 = arith.addf %68, %71 : vector<8x1xf32>
      %73 = math.rsqrt %72 : vector<8x1xf32>
      %74 = vector.broadcast %73 : vector<8x1xf32> to vector<8x32xf32>
      %75 = arith.mulf %70, %74 : vector<8x32xf32>
      %c0_34 = arith.constant 0 : index
      %c0_35 = arith.constant 0 : index
      %76 = vector.load %arg8[%c0_34, %c0_35] : memref<1x32xf32, #tpu.memory_space<vmem>>, vector<1x32xf32>
      %77 = vector.broadcast %76 : vector<1x32xf32> to vector<8x32xf32>
      %78 = arith.mulf %75, %77 : vector<8x32xf32>
      %c0_36 = arith.constant 0 : index
      %c0_37 = arith.constant 0 : index
      %79 = vector.load %arg9[%c0_36, %c0_37] : memref<1x32xf32, #tpu.memory_space<vmem>>, vector<1x32xf32>
      %80 = vector.broadcast %79 : vector<1x32xf32> to vector<8x32xf32>
      %81 = arith.addf %78, %80 : vector<8x32xf32>
      %82 = arith.truncf %81 : vector<8x32xf32> to vector<8x32xbf16>
      %c0_38 = arith.constant 0 : index
      %c0_39 = arith.constant 0 : index
      %83 = vector.load %arg10[%c0_38, %c0_39] : memref<8x32xbf16, #tpu.memory_space<vmem>>, vector<8x32xbf16>
      tpu.vector_store %arg10[%c0_38, %c0_39], %82 {strides = array<i32>} : memref<8x32xbf16, #tpu.memory_space<vmem>>, vector<8x32xbf16>,
    } else {
    }
    return
  }
  func.func @transform_0(%arg0: i32, %arg1: i32) -> (i32, i32) {
    %c0_i32 = arith.constant 0 : i32
    %c0_i32_0 = arith.constant 0 : i32
    return %arg0, %c0_i32 : i32, i32
  }
  func.func @transform_1(%arg0: i32, %arg1: i32) -> (i32, i32) {
    %c0_i32 = arith.constant 0 : i32
    %c0_i32_0 = arith.constant 0 : i32
    return %arg0, %c0_i32 : i32, i32
  }
  func.func @transform_2(%arg0: i32, %arg1: i32) -> (i32, i32, i32) {
    %c0_i32 = arith.constant 0 : i32
    %c0_i32_0 = arith.constant 0 : i32
    %c0_i32_1 = arith.constant 0 : i32
    return %arg1, %c0_i32, %c0_i32_0 : i32, i32, i32
  }
  func.func @transform_3(%arg0: i32, %arg1: i32) -> (i32, i32, i32) {
    %c0_i32 = arith.constant 0 : i32
    %c0_i32_0 = arith.constant 0 : i32
    %c0_i32_1 = arith.constant 0 : i32
    return %arg1, %c0_i32, %c0_i32_0 : i32, i32, i32
  }
  func.func @transform_4(%arg0: i32, %arg1: i32) -> (i32, i32, i32) {
    %c0_i32 = arith.constant 0 : i32
    %c0_i32_0 = arith.constant 0 : i32
    %c0_i32_1 = arith.constant 0 : i32
    return %arg1, %c0_i32, %c0_i32_0 : i32, i32, i32
  }
  func.func @transform_5(%arg0: i32, %arg1: i32) -> (i32, i32) {
    %c0_i32 = arith.constant 0 : i32
    %c0_i32_0 = arith.constant 0 : i32
    %c0_i32_1 = arith.constant 0 : i32
    return %c0_i32, %c0_i32_0 : i32, i32
  }
  func.func @transform_6(%arg0: i32, %arg1: i32) -> (i32, i32) {
    %c0_i32 = arith.constant 0 : i32
    %c0_i32_0 = arith.constant 0 : i32
    %c0_i32_1 = arith.constant 0 : i32
    return %c0_i32, %c0_i32_0 : i32, i32
  }
  func.func @transform_7(%arg0: i32, %arg1: i32) -> (i32, i32) {
    %c0_i32 = arith.constant 0 : i32
    %c0_i32_0 = arith.constant 0 : i32
    %c0_i32_1 = arith.constant 0 : i32
    return %c0_i32, %c0_i32_0 : i32, i32
  }
  func.func @transform_8(%arg0: i32, %arg1: i32) -> (i32, i32) {
    %c0_i32 = arith.constant 0 : i32
    %c0_i32_0 = arith.constant 0 : i32
    return %arg0, %c0_i32 : i32, i32
  }
}

module attributes {stable_mosaic.version = 11 : i64} {
  func.func @_fused_mha_kernel(%arg0: i32, %arg1: i32, %arg2: memref<8x32xbf16, #tpu.memory_space<vmem>>, %arg3: memref<8x32xbf16, #tpu.memory_space<vmem>>, %arg4: memref<1x32x24xbf16, #tpu.memory_space<vmem>>, %arg5: memref<1x1x24xf32, #tpu.memory_space<vmem>>, %arg6: memref<1x8x32xbf16, #tpu.memory_space<vmem>>, %arg7: memref<1x32xf32, #tpu.memory_space<vmem>>, %arg8: memref<1x32xf32, #tpu.memory_space<vmem>>, %arg9: memref<1x32xf32, #tpu.memory_space<vmem>>, %arg10: memref<8x32xbf16, #tpu.memory_space<vmem>>, %arg11: memref<8x32xf32, #tpu.memory_space<vmem>>) attributes {dimension_semantics = [#tpu.dimension_semantics<parallel>, #tpu.dimension_semantics<arbitrary>], iteration_bounds = array<i64: 2, 4>, scalar_prefetch = 0 : i64, scratch_operands = 1 : i64, tpu.core_type = #tpu.core_type<tc>, window_params = [{transform_indices = @transform_0, window_bounds = array<i64: 8, 32>}, {transform_indices = @transform_1, window_bounds = array<i64: 8, 32>}, {transform_indices = @transform_2, window_bounds = array<i64: 1, 32, 24>}, {transform_indices = @transform_3, window_bounds = array<i64: 1, 1, 24>}, {transform_indices = @transform_4, window_bounds = array<i64: 1, 8, 32>}, {pipeline_mode = #tpu.pipeline_mode<synchronous>, transform_indices = @transform_5, window_bounds = array<i64: 1, 32>}, {pipeline_mode = #tpu.pipeline_mode<synchronous>, transform_indices = @transform_6, window_bounds = array<i64: 1, 32>}, {pipeline_mode = #tpu.pipeline_mode<synchronous>, transform_indices = @transform_7, window_bounds = array<i64: 1, 32>}, {transform_indices = @transform_8, window_bounds = array<i64: 8, 32>}]} {
    %c0 = arith.constant 0 : index
    %c0_0 = arith.constant 0 : index
    %0 = vector.load %arg2[%c0, %c0_0] : memref<8x32xbf16, #tpu.memory_space<vmem>>, vector<8x32xbf16>
    %c0_1 = arith.constant 0 : index
    %c0_2 = arith.constant 0 : index
    %1 = vector.load %arg3[%c0_1, %c0_2] : memref<8x32xbf16, #tpu.memory_space<vmem>>, vector<8x32xbf16>
    %c0_3 = arith.constant 0 : index
    %c0_4 = arith.constant 0 : index
    %c0_5 = arith.constant 0 : index
    %2 = vector.load %arg4[%c0_3, %c0_4, %c0_5] : memref<1x32x24xbf16, #tpu.memory_space<vmem>>, vector<1x32x24xbf16>
    %3 = vector.shape_cast %2 : vector<1x32x24xbf16> to vector<32x24xbf16>
    %c0_6 = arith.constant 0 : index
    %c0_7 = arith.constant 0 : index
    %c0_8 = arith.constant 0 : index
    %4 = vector.load %arg5[%c0_6, %c0_7, %c0_8] : memref<1x1x24xf32, #tpu.memory_space<vmem>>, vector<1x1x24xf32>
    %5 = vector.shape_cast %4 : vector<1x1x24xf32> to vector<1x24xf32>
    %6 = vector.extract_strided_slice %3 {offsets = [0, 0], sizes = [32, 8], strides = [1, 1]} : vector<32x24xbf16> to vector<32x8xbf16>
    %cst = arith.constant dense<0.000000e+00> : vector<8x8xf32>
    %7 = tpu.matmul %0, %6, %cst {dimension_numbers = #tpu.dot_dimension_numbers<[1], [0], [0], [1], [0, 0, 1, 1], [], []>} : vector<8x32xbf16>, vector<32x8xbf16>, vector<8x8xf32> -> vector<8x8xf32>
    %8 = vector.extract_strided_slice %5 {offsets = [0, 0], sizes = [1, 8], strides = [1, 1]} : vector<1x24xf32> to vector<1x8xf32>
    %9 = vector.broadcast %8 : vector<1x8xf32> to vector<8x8xf32>
    %10 = arith.addf %7, %9 : vector<8x8xf32>
    %11 = arith.truncf %10 : vector<8x8xf32> to vector<8x8xbf16>
    %12 = vector.extract_strided_slice %3 {offsets = [0, 8], sizes = [32, 16], strides = [1, 1]} : vector<32x24xbf16> to vector<32x16xbf16>
    %cst_9 = arith.constant dense<0.000000e+00> : vector<8x16xf32>
    %13 = tpu.matmul %1, %12, %cst_9 {dimension_numbers = #tpu.dot_dimension_numbers<[1], [0], [0], [1], [0, 0, 1, 1], [], []>} : vector<8x32xbf16>, vector<32x16xbf16>, vector<8x16xf32> -> vector<8x16xf32>
    %14 = vector.extract_strided_slice %5 {offsets = [0, 8], sizes = [1, 16], strides = [1, 1]} : vector<1x24xf32> to vector<1x16xf32>
    %15 = vector.broadcast %14 : vector<1x16xf32> to vector<8x16xf32>
    %16 = arith.addf %13, %15 : vector<8x16xf32>
    %17 = vector.extract_strided_slice %16 {offsets = [0, 0], sizes = [8, 8], strides = [1, 1]} : vector<8x16xf32> to vector<8x8xf32>
    %18 = arith.truncf %17 : vector<8x8xf32> to vector<8x8xbf16>
    %19 = vector.extract_strided_slice %16 {offsets = [0, 8], sizes = [8, 8], strides = [1, 1]} : vector<8x16xf32> to vector<8x8xf32>
    %20 = arith.truncf %19 : vector<8x8xf32> to vector<8x8xbf16>
    %cst_10 = arith.constant dense<0.000000e+00> : vector<8x8xf32>
    %21 = tpu.matmul %11, %18, %cst_10 {dimension_numbers = #tpu.dot_dimension_numbers<[1], [1], [0], [0], [0, 0, 1, 0], [], []>} : vector<8x8xbf16>, vector<8x8xbf16>, vector<8x8xf32> -> vector<8x8xf32>
    %cst_11 = arith.constant dense<0xFF800000> : vector<8xf32>
    %22 = vector.multi_reduction <maximumf>, %21, %cst_11 [1] : vector<8x8xf32> to vector<8xf32>
    %23 = vector.shape_cast %22 : vector<8xf32> to vector<8x1xf32>
    %24 = vector.broadcast %23 : vector<8x1xf32> to vector<8x8xf32>
    %25 = arith.subf %21, %24 : vector<8x8xf32>
    %26 = math.exp %25 : vector<8x8xf32>
    %cst_12 = arith.constant dense<0.000000e+00> : vector<8xf32>
    %27 = vector.multi_reduction <add>, %26, %cst_12 [1] : vector<8x8xf32> to vector<8xf32>
    %28 = vector.shape_cast %27 : vector<8xf32> to vector<8x1xf32>
    %29 = tpu.reciprocal %28 {approx = true} : vector<8x1xf32> -> vector<8x1xf32>
    %30 = vector.broadcast %29 : vector<8x1xf32> to vector<8x8xf32>
    %31 = arith.mulf %26, %30 : vector<8x8xf32>
    %32 = arith.truncf %31 : vector<8x8xf32> to vector<8x8xbf16>
    %cst_13 = arith.constant dense<0.000000e+00> : vector<8x8xf32>
    %33 = tpu.matmul %32, %20, %cst_13 {dimension_numbers = #tpu.dot_dimension_numbers<[1], [0], [0], [1], [0, 0, 1, 1], [], []>} : vector<8x8xbf16>, vector<8x8xbf16>, vector<8x8xf32> -> vector<8x8xf32>
    %c0_i32 = arith.constant 0 : i32
    %34 = arith.cmpi eq, %arg1, %c0_i32 : i32
    %35 = arith.extui %34 : i1 to i32
    %c0_i32_14 = arith.constant 0 : i32
    %36 = arith.cmpi ne, %35, %c0_i32_14 : i32
    scf.if %36 {
      %cst_24 = arith.constant 0.000000e+00 : f32
      %47 = vector.broadcast %cst_24 : f32 to vector<8x32xf32>
      %c0_25 = arith.constant 0 : index
      %c0_26 = arith.constant 0 : index
      %48 = vector.load %arg11[%c0_25, %c0_26] : memref<8x32xf32, #tpu.memory_space<vmem>>, vector<8x32xf32>
      tpu.vector_store %arg11[%c0_25, %c0_26], %47 {strides = array<i32>} : memref<8x32xf32, #tpu.memory_space<vmem>>, vector<8x32xf32>,
    } else {
    }
    %c0_15 = arith.constant 0 : index
    %c0_16 = arith.constant 0 : index
    %37 = vector.load %arg11[%c0_15, %c0_16] : memref<8x32xf32, #tpu.memory_space<vmem>>, vector<8x32xf32>
    %38 = arith.truncf %33 : vector<8x8xf32> to vector<8x8xbf16>
    %c0_17 = arith.constant 0 : index
    %c0_18 = arith.constant 0 : index
    %c0_19 = arith.constant 0 : index
    %39 = vector.load %arg6[%c0_17, %c0_18, %c0_19] : memref<1x8x32xbf16, #tpu.memory_space<vmem>>, vector<1x8x32xbf16>
    %40 = vector.shape_cast %39 : vector<1x8x32xbf16> to vector<8x32xbf16>
    %cst_20 = arith.constant dense<0.000000e+00> : vector<8x32xf32>
    %41 = tpu.matmul %38, %40, %cst_20 {dimension_numbers = #tpu.dot_dimension_numbers<[1], [0], [0], [1], [0, 0, 1, 1], [], []>} : vector<8x8xbf16>, vector<8x32xbf16>, vector<8x32xf32> -> vector<8x32xf32>
    %42 = arith.addf %37, %41 : vector<8x32xf32>
    %c0_21 = arith.constant 0 : index
    %c0_22 = arith.constant 0 : index
    %43 = vector.load %arg11[%c0_21, %c0_22] : memref<8x32xf32, #tpu.memory_space<vmem>>, vector<8x32xf32>
    tpu.vector_store %arg11[%c0_21, %c0_22], %42 {strides = array<i32>} : memref<8x32xf32, #tpu.memory_space<vmem>>, vector<8x32xf32>,
    %c3_i32 = arith.constant 3 : i32
    %44 = arith.cmpi eq, %arg1, %c3_i32 : i32
    %45 = arith.extui %44 : i1 to i32
    %c0_i32_23 = arith.constant 0 : i32
    %46 = arith.cmpi ne, %45, %c0_i32_23 : i32
    scf.if %46 {
      %c0_24 = arith.constant 0 : index
      %c0_25 = arith.constant 0 : index
      %47 = vector.load %arg11[%c0_24, %c0_25] : memref<8x32xf32, #tpu.memory_space<vmem>>, vector<8x32xf32>
      %c0_26 = arith.constant 0 : index
      %c0_27 = arith.constant 0 : index
      %48 = vector.load %arg7[%c0_26, %c0_27] : memref<1x32xf32, #tpu.memory_space<vmem>>, vector<1x32xf32>
      %49 = vector.broadcast %48 : vector<1x32xf32> to vector<8x32xf32>
      %50 = arith.addf %47, %49 : vector<8x32xf32>
      %51 = arith.extf %0 : vector<8x32xbf16> to vector<8x32xf32>
      %52 = arith.addf %50, %51 : vector<8x32xf32>
      %cst_28 = arith.constant dense<0.000000e+00> : vector<8xf32>
      %53 = vector.multi_reduction <add>, %52, %cst_28 [1] : vector<8x32xf32> to vector<8xf32>
      %54 = vector.shape_cast %53 : vector<8xf32> to vector<8x1xf32>
      %cst_29 = arith.constant 3.200000e+01 : f32
      %55 = vector.broadcast %cst_29 : f32 to vector<8x1xf32>
      %56 = arith.divf %54, %55 : vector<8x1xf32>
      %57 = vector.broadcast %56 : vector<8x1xf32> to vector<8x32xf32>
      %58 = arith.subf %52, %57 : vector<8x32xf32>
      %59 = arith.mulf %58, %58 : vector<8x32xf32>
      %cst_30 = arith.constant dense<0.000000e+00> : vector<8xf32>
      %60 = vector.multi_reduction <add>, %59, %cst_30 [1] : vector<8x32xf32> to vector<8xf32>
      %61 = vector.shape_cast %60 : vector<8xf32> to vector<8x1xf32>
      %cst_31 = arith.constant 3.200000e+01 : f32
      %62 = vector.broadcast %cst_31 : f32 to vector<8x1xf32>
      %63 = arith.divf %61, %62 : vector<8x1xf32>
      %64 = vector.broadcast %56 : vector<8x1xf32> to vector<8x32xf32>
      %65 = arith.subf %52, %64 : vector<8x32xf32>
      %cst_32 = arith.constant 9.99999974E-6 : f32
      %66 = vector.broadcast %cst_32 : f32 to vector<8x1xf32>
      %67 = arith.addf %63, %66 : vector<8x1xf32>
      %68 = math.rsqrt %67 : vector<8x1xf32>
      %69 = vector.broadcast %68 : vector<8x1xf32> to vector<8x32xf32>
      %70 = arith.mulf %65, %69 : vector<8x32xf32>
      %c0_33 = arith.constant 0 : index
      %c0_34 = arith.constant 0 : index
      %71 = vector.load %arg8[%c0_33, %c0_34] : memref<1x32xf32, #tpu.memory_space<vmem>>, vector<1x32xf32>
      %72 = vector.broadcast %71 : vector<1x32xf32> to vector<8x32xf32>
      %73 = arith.mulf %70, %72 : vector<8x32xf32>
      %c0_35 = arith.constant 0 : index
      %c0_36 = arith.constant 0 : index
      %74 = vector.load %arg9[%c0_35, %c0_36] : memref<1x32xf32, #tpu.memory_space<vmem>>, vector<1x32xf32>
      %75 = vector.broadcast %74 : vector<1x32xf32> to vector<8x32xf32>
      %76 = arith.addf %73, %75 : vector<8x32xf32>
      %77 = arith.truncf %76 : vector<8x32xf32> to vector<8x32xbf16>
      %c0_37 = arith.constant 0 : index
      %c0_38 = arith.constant 0 : index
      %78 = vector.load %arg10[%c0_37, %c0_38] : memref<8x32xbf16, #tpu.memory_space<vmem>>, vector<8x32xbf16>
      tpu.vector_store %arg10[%c0_37, %c0_38], %77 {strides = array<i32>} : memref<8x32xbf16, #tpu.memory_space<vmem>>, vector<8x32xbf16>,
    } else {
    }
    return
  }
  func.func @transform_0(%arg0: i32, %arg1: i32) -> (i32, i32) {
    %c0_i32 = arith.constant 0 : i32
    %c0_i32_0 = arith.constant 0 : i32
    return %arg0, %c0_i32 : i32, i32
  }
  func.func @transform_1(%arg0: i32, %arg1: i32) -> (i32, i32) {
    %c0_i32 = arith.constant 0 : i32
    %c0_i32_0 = arith.constant 0 : i32
    return %arg0, %c0_i32 : i32, i32
  }
  func.func @transform_2(%arg0: i32, %arg1: i32) -> (i32, i32, i32) {
    %c0_i32 = arith.constant 0 : i32
    %c0_i32_0 = arith.constant 0 : i32
    %c0_i32_1 = arith.constant 0 : i32
    return %arg1, %c0_i32, %c0_i32_0 : i32, i32, i32
  }
  func.func @transform_3(%arg0: i32, %arg1: i32) -> (i32, i32, i32) {
    %c0_i32 = arith.constant 0 : i32
    %c0_i32_0 = arith.constant 0 : i32
    %c0_i32_1 = arith.constant 0 : i32
    return %arg1, %c0_i32, %c0_i32_0 : i32, i32, i32
  }
  func.func @transform_4(%arg0: i32, %arg1: i32) -> (i32, i32, i32) {
    %c0_i32 = arith.constant 0 : i32
    %c0_i32_0 = arith.constant 0 : i32
    %c0_i32_1 = arith.constant 0 : i32
    return %arg1, %c0_i32, %c0_i32_0 : i32, i32, i32
  }
  func.func @transform_5(%arg0: i32, %arg1: i32) -> (i32, i32) {
    %c0_i32 = arith.constant 0 : i32
    %c0_i32_0 = arith.constant 0 : i32
    %c0_i32_1 = arith.constant 0 : i32
    return %c0_i32, %c0_i32_0 : i32, i32
  }
  func.func @transform_6(%arg0: i32, %arg1: i32) -> (i32, i32) {
    %c0_i32 = arith.constant 0 : i32
    %c0_i32_0 = arith.constant 0 : i32
    %c0_i32_1 = arith.constant 0 : i32
    return %c0_i32, %c0_i32_0 : i32, i32
  }
  func.func @transform_7(%arg0: i32, %arg1: i32) -> (i32, i32) {
    %c0_i32 = arith.constant 0 : i32
    %c0_i32_0 = arith.constant 0 : i32
    %c0_i32_1 = arith.constant 0 : i32
    return %c0_i32, %c0_i32_0 : i32, i32
  }
  func.func @transform_8(%arg0: i32, %arg1: i32) -> (i32, i32) {
    %c0_i32 = arith.constant 0 : i32
    %c0_i32_0 = arith.constant 0 : i32
    return %arg0, %c0_i32 : i32, i32
  }
}

module attributes {stable_mosaic.version = 11 : i64} {
  func.func @_linear_kernel(%arg0: i32, %arg1: i32, %arg2: i32, %arg3: memref<16x32xbf16, #tpu.memory_space<vmem>>, %arg4: memref<32x128xbf16, #tpu.memory_space<vmem>>, %arg5: memref<1x128xf32, #tpu.memory_space<vmem>>, %arg6: memref<16x128xbf16, #tpu.memory_space<vmem>>, %arg7: memref<16x128xf32, #tpu.memory_space<vmem>>) attributes {dimension_semantics = [#tpu.dimension_semantics<parallel>, #tpu.dimension_semantics<parallel>, #tpu.dimension_semantics<arbitrary>], iteration_bounds = array<i64: 1, 1, 1>, scalar_prefetch = 0 : i64, scratch_operands = 1 : i64, tpu.core_type = #tpu.core_type<tc>, window_params = [{transform_indices = @transform_0, window_bounds = array<i64: 16, 32>}, {transform_indices = @transform_1, window_bounds = array<i64: 32, 128>}, {transform_indices = @transform_2, window_bounds = array<i64: 1, 128>}, {transform_indices = @transform_3, window_bounds = array<i64: 16, 128>}]} {
    %c0_i32 = arith.constant 0 : i32
    %0 = arith.cmpi eq, %arg2, %c0_i32 : i32
    %1 = arith.extui %0 : i1 to i32
    %c0_i32_0 = arith.constant 0 : i32
    %2 = arith.cmpi ne, %1, %c0_i32_0 : i32
    scf.if %2 {
      %cst_10 = arith.constant 0.000000e+00 : f32
      %12 = vector.broadcast %cst_10 : f32 to vector<16x128xf32>
      %c0_11 = arith.constant 0 : index
      %c0_12 = arith.constant 0 : index
      %13 = vector.load %arg7[%c0_11, %c0_12] : memref<16x128xf32, #tpu.memory_space<vmem>>, vector<16x128xf32>
      tpu.vector_store %arg7[%c0_11, %c0_12], %12 {strides = array<i32>} : memref<16x128xf32, #tpu.memory_space<vmem>>, vector<16x128xf32>,
    } else {
    }
    %c0 = arith.constant 0 : index
    %c0_1 = arith.constant 0 : index
    %3 = vector.load %arg7[%c0, %c0_1] : memref<16x128xf32, #tpu.memory_space<vmem>>, vector<16x128xf32>
    %c0_2 = arith.constant 0 : index
    %c0_3 = arith.constant 0 : index
    %4 = vector.load %arg3[%c0_2, %c0_3] : memref<16x32xbf16, #tpu.memory_space<vmem>>, vector<16x32xbf16>
    %c0_4 = arith.constant 0 : index
    %c0_5 = arith.constant 0 : index
    %5 = vector.load %arg4[%c0_4, %c0_5] : memref<32x128xbf16, #tpu.memory_space<vmem>>, vector<32x128xbf16>
    %cst = arith.constant dense<0.000000e+00> : vector<16x128xf32>
    %6 = tpu.matmul %4, %5, %cst {dimension_numbers = #tpu.dot_dimension_numbers<[1], [0], [0], [1], [0, 0, 1, 1], [], []>} : vector<16x32xbf16>, vector<32x128xbf16>, vector<16x128xf32> -> vector<16x128xf32>
    %7 = arith.addf %3, %6 : vector<16x128xf32>
    %c0_6 = arith.constant 0 : index
    %c0_7 = arith.constant 0 : index
    %8 = vector.load %arg7[%c0_6, %c0_7] : memref<16x128xf32, #tpu.memory_space<vmem>>, vector<16x128xf32>
    tpu.vector_store %arg7[%c0_6, %c0_7], %7 {strides = array<i32>} : memref<16x128xf32, #tpu.memory_space<vmem>>, vector<16x128xf32>,
    %c0_i32_8 = arith.constant 0 : i32
    %9 = arith.cmpi eq, %arg2, %c0_i32_8 : i32
    %10 = arith.extui %9 : i1 to i32
    %c0_i32_9 = arith.constant 0 : i32
    %11 = arith.cmpi ne, %10, %c0_i32_9 : i32
    scf.if %11 {
      %c0_10 = arith.constant 0 : index
      %c0_11 = arith.constant 0 : index
      %12 = vector.load %arg7[%c0_10, %c0_11] : memref<16x128xf32, #tpu.memory_space<vmem>>, vector<16x128xf32>
      %c0_12 = arith.constant 0 : index
      %c0_13 = arith.constant 0 : index
      %13 = vector.load %arg5[%c0_12, %c0_13] : memref<1x128xf32, #tpu.memory_space<vmem>>, vector<1x128xf32>
      %14 = vector.broadcast %13 : vector<1x128xf32> to vector<16x128xf32>
      %15 = arith.addf %12, %14 : vector<16x128xf32>
      %cst_14 = arith.constant 0.000000e+00 : f32
      %16 = vector.broadcast %cst_14 : f32 to vector<16x128xf32>
      %17 = arith.maximumf %15, %16 : vector<16x128xf32>
      %18 = arith.truncf %17 : vector<16x128xf32> to vector<16x128xbf16>
      %c0_15 = arith.constant 0 : index
      %c0_16 = arith.constant 0 : index
      %19 = vector.load %arg6[%c0_15, %c0_16] : memref<16x128xbf16, #tpu.memory_space<vmem>>, vector<16x128xbf16>
      tpu.vector_store %arg6[%c0_15, %c0_16], %18 {strides = array<i32>} : memref<16x128xbf16, #tpu.memory_space<vmem>>, vector<16x128xbf16>,
    } else {
    }
    return
  }
  func.func @transform_0(%arg0: i32, %arg1: i32, %arg2: i32) -> (i32, i32) {
    %c0_i32 = arith.constant 0 : i32
    return %arg0, %arg2 : i32, i32
  }
  func.func @transform_1(%arg0: i32, %arg1: i32, %arg2: i32) -> (i32, i32) {
    %c0_i32 = arith.constant 0 : i32
    return %arg2, %arg1 : i32, i32
  }
  func.func @transform_2(%arg0: i32, %arg1: i32, %arg2: i32) -> (i32, i32) {
    %c0_i32 = arith.constant 0 : i32
    %c0_i32_0 = arith.constant 0 : i32
    return %c0_i32, %arg1 : i32, i32
  }
  func.func @transform_3(%arg0: i32, %arg1: i32, %arg2: i32) -> (i32, i32) {
    %c0_i32 = arith.constant 0 : i32
    return %arg0, %arg1 : i32, i32
  }
}

module attributes {stable_mosaic.version = 11 : i64} {
  func.func @_linear_kernel(%arg0: i32, %arg1: i32, %arg2: i32, %arg3: memref<16x32xbf16, #tpu.memory_space<vmem>>, %arg4: memref<32x16xbf16, #tpu.memory_space<vmem>>, %arg5: memref<1x16xf32, #tpu.memory_space<vmem>>, %arg6: memref<16x16xf32, #tpu.memory_space<vmem>>, %arg7: memref<16x16xf32, #tpu.memory_space<vmem>>) attributes {dimension_semantics = [#tpu.dimension_semantics<parallel>, #tpu.dimension_semantics<parallel>, #tpu.dimension_semantics<arbitrary>], iteration_bounds = array<i64: 1, 1, 1>, scalar_prefetch = 0 : i64, scratch_operands = 1 : i64, tpu.core_type = #tpu.core_type<tc>, window_params = [{transform_indices = @transform_0, window_bounds = array<i64: 16, 32>}, {transform_indices = @transform_1, window_bounds = array<i64: 32, 16>}, {transform_indices = @transform_2, window_bounds = array<i64: 1, 16>}, {transform_indices = @transform_3, window_bounds = array<i64: 16, 16>}]} {
    %c0_i32 = arith.constant 0 : i32
    %0 = arith.cmpi eq, %arg2, %c0_i32 : i32
    %1 = arith.extui %0 : i1 to i32
    %c0_i32_0 = arith.constant 0 : i32
    %2 = arith.cmpi ne, %1, %c0_i32_0 : i32
    scf.if %2 {
      %cst_10 = arith.constant 0.000000e+00 : f32
      %12 = vector.broadcast %cst_10 : f32 to vector<16x16xf32>
      %c0_11 = arith.constant 0 : index
      %c0_12 = arith.constant 0 : index
      %13 = vector.load %arg7[%c0_11, %c0_12] : memref<16x16xf32, #tpu.memory_space<vmem>>, vector<16x16xf32>
      tpu.vector_store %arg7[%c0_11, %c0_12], %12 {strides = array<i32>} : memref<16x16xf32, #tpu.memory_space<vmem>>, vector<16x16xf32>,
    } else {
    }
    %c0 = arith.constant 0 : index
    %c0_1 = arith.constant 0 : index
    %3 = vector.load %arg7[%c0, %c0_1] : memref<16x16xf32, #tpu.memory_space<vmem>>, vector<16x16xf32>
    %c0_2 = arith.constant 0 : index
    %c0_3 = arith.constant 0 : index
    %4 = vector.load %arg3[%c0_2, %c0_3] : memref<16x32xbf16, #tpu.memory_space<vmem>>, vector<16x32xbf16>
    %c0_4 = arith.constant 0 : index
    %c0_5 = arith.constant 0 : index
    %5 = vector.load %arg4[%c0_4, %c0_5] : memref<32x16xbf16, #tpu.memory_space<vmem>>, vector<32x16xbf16>
    %cst = arith.constant dense<0.000000e+00> : vector<16x16xf32>
    %6 = tpu.matmul %4, %5, %cst {dimension_numbers = #tpu.dot_dimension_numbers<[1], [0], [0], [1], [0, 0, 1, 1], [], []>} : vector<16x32xbf16>, vector<32x16xbf16>, vector<16x16xf32> -> vector<16x16xf32>
    %7 = arith.addf %3, %6 : vector<16x16xf32>
    %c0_6 = arith.constant 0 : index
    %c0_7 = arith.constant 0 : index
    %8 = vector.load %arg7[%c0_6, %c0_7] : memref<16x16xf32, #tpu.memory_space<vmem>>, vector<16x16xf32>
    tpu.vector_store %arg7[%c0_6, %c0_7], %7 {strides = array<i32>} : memref<16x16xf32, #tpu.memory_space<vmem>>, vector<16x16xf32>,
    %c0_i32_8 = arith.constant 0 : i32
    %9 = arith.cmpi eq, %arg2, %c0_i32_8 : i32
    %10 = arith.extui %9 : i1 to i32
    %c0_i32_9 = arith.constant 0 : i32
    %11 = arith.cmpi ne, %10, %c0_i32_9 : i32
    scf.if %11 {
      %c0_10 = arith.constant 0 : index
      %c0_11 = arith.constant 0 : index
      %12 = vector.load %arg7[%c0_10, %c0_11] : memref<16x16xf32, #tpu.memory_space<vmem>>, vector<16x16xf32>
      %c0_12 = arith.constant 0 : index
      %c0_13 = arith.constant 0 : index
      %13 = vector.load %arg5[%c0_12, %c0_13] : memref<1x16xf32, #tpu.memory_space<vmem>>, vector<1x16xf32>
      %14 = vector.broadcast %13 : vector<1x16xf32> to vector<16x16xf32>
      %15 = arith.addf %12, %14 : vector<16x16xf32>
      %c0_14 = arith.constant 0 : index
      %c0_15 = arith.constant 0 : index
      %16 = vector.load %arg6[%c0_14, %c0_15] : memref<16x16xf32, #tpu.memory_space<vmem>>, vector<16x16xf32>
      tpu.vector_store %arg6[%c0_14, %c0_15], %15 {strides = array<i32>} : memref<16x16xf32, #tpu.memory_space<vmem>>, vector<16x16xf32>,
    } else {
    }
    return
  }
  func.func @transform_0(%arg0: i32, %arg1: i32, %arg2: i32) -> (i32, i32) {
    %c0_i32 = arith.constant 0 : i32
    return %arg0, %arg2 : i32, i32
  }
  func.func @transform_1(%arg0: i32, %arg1: i32, %arg2: i32) -> (i32, i32) {
    %c0_i32 = arith.constant 0 : i32
    return %arg2, %arg1 : i32, i32
  }
  func.func @transform_2(%arg0: i32, %arg1: i32, %arg2: i32) -> (i32, i32) {
    %c0_i32 = arith.constant 0 : i32
    %c0_i32_0 = arith.constant 0 : i32
    return %c0_i32, %arg1 : i32, i32
  }
  func.func @transform_3(%arg0: i32, %arg1: i32, %arg2: i32) -> (i32, i32) {
    %c0_i32 = arith.constant 0 : i32
    return %arg0, %arg1 : i32, i32
  }
}

module attributes {stable_mosaic.version = 11 : i64} {
  func.func @_linear_kernel(%arg0: i32, %arg1: i32, %arg2: i32, %arg3: memref<16x128xbf16, #tpu.memory_space<vmem>>, %arg4: memref<128x32xbf16, #tpu.memory_space<vmem>>, %arg5: memref<1x32xf32, #tpu.memory_space<vmem>>, %arg6: memref<16x32xbf16, #tpu.memory_space<vmem>>, %arg7: memref<1x32xf32, #tpu.memory_space<vmem>>, %arg8: memref<1x32xf32, #tpu.memory_space<vmem>>, %arg9: memref<16x32xbf16, #tpu.memory_space<vmem>>, %arg10: memref<16x32xf32, #tpu.memory_space<vmem>>) attributes {dimension_semantics = [#tpu.dimension_semantics<parallel>, #tpu.dimension_semantics<parallel>, #tpu.dimension_semantics<arbitrary>], iteration_bounds = array<i64: 1, 1, 1>, scalar_prefetch = 0 : i64, scratch_operands = 1 : i64, tpu.core_type = #tpu.core_type<tc>, window_params = [{transform_indices = @transform_0, window_bounds = array<i64: 16, 128>}, {transform_indices = @transform_1, window_bounds = array<i64: 128, 32>}, {transform_indices = @transform_2, window_bounds = array<i64: 1, 32>}, {transform_indices = @transform_3, window_bounds = array<i64: 16, 32>}, {transform_indices = @transform_4, window_bounds = array<i64: 1, 32>}, {transform_indices = @transform_5, window_bounds = array<i64: 1, 32>}, {transform_indices = @transform_6, window_bounds = array<i64: 16, 32>}]} {
    %c0_i32 = arith.constant 0 : i32
    %0 = arith.cmpi eq, %arg2, %c0_i32 : i32
    %1 = arith.extui %0 : i1 to i32
    %c0_i32_0 = arith.constant 0 : i32
    %2 = arith.cmpi ne, %1, %c0_i32_0 : i32
    scf.if %2 {
      %cst_10 = arith.constant 0.000000e+00 : f32
      %12 = vector.broadcast %cst_10 : f32 to vector<16x32xf32>
      %c0_11 = arith.constant 0 : index
      %c0_12 = arith.constant 0 : index
      %13 = vector.load %arg10[%c0_11, %c0_12] : memref<16x32xf32, #tpu.memory_space<vmem>>, vector<16x32xf32>
      tpu.vector_store %arg10[%c0_11, %c0_12], %12 {strides = array<i32>} : memref<16x32xf32, #tpu.memory_space<vmem>>, vector<16x32xf32>,
    } else {
    }
    %c0 = arith.constant 0 : index
    %c0_1 = arith.constant 0 : index
    %3 = vector.load %arg10[%c0, %c0_1] : memref<16x32xf32, #tpu.memory_space<vmem>>, vector<16x32xf32>
    %c0_2 = arith.constant 0 : index
    %c0_3 = arith.constant 0 : index
    %4 = vector.load %arg3[%c0_2, %c0_3] : memref<16x128xbf16, #tpu.memory_space<vmem>>, vector<16x128xbf16>
    %c0_4 = arith.constant 0 : index
    %c0_5 = arith.constant 0 : index
    %5 = vector.load %arg4[%c0_4, %c0_5] : memref<128x32xbf16, #tpu.memory_space<vmem>>, vector<128x32xbf16>
    %cst = arith.constant dense<0.000000e+00> : vector<16x32xf32>
    %6 = tpu.matmul %4, %5, %cst {dimension_numbers = #tpu.dot_dimension_numbers<[1], [0], [0], [1], [0, 0, 1, 1], [], []>} : vector<16x128xbf16>, vector<128x32xbf16>, vector<16x32xf32> -> vector<16x32xf32>
    %7 = arith.addf %3, %6 : vector<16x32xf32>
    %c0_6 = arith.constant 0 : index
    %c0_7 = arith.constant 0 : index
    %8 = vector.load %arg10[%c0_6, %c0_7] : memref<16x32xf32, #tpu.memory_space<vmem>>, vector<16x32xf32>
    tpu.vector_store %arg10[%c0_6, %c0_7], %7 {strides = array<i32>} : memref<16x32xf32, #tpu.memory_space<vmem>>, vector<16x32xf32>,
    %c0_i32_8 = arith.constant 0 : i32
    %9 = arith.cmpi eq, %arg2, %c0_i32_8 : i32
    %10 = arith.extui %9 : i1 to i32
    %c0_i32_9 = arith.constant 0 : i32
    %11 = arith.cmpi ne, %10, %c0_i32_9 : i32
    scf.if %11 {
      %c0_10 = arith.constant 0 : index
      %c0_11 = arith.constant 0 : index
      %12 = vector.load %arg10[%c0_10, %c0_11] : memref<16x32xf32, #tpu.memory_space<vmem>>, vector<16x32xf32>
      %c0_12 = arith.constant 0 : index
      %c0_13 = arith.constant 0 : index
      %13 = vector.load %arg5[%c0_12, %c0_13] : memref<1x32xf32, #tpu.memory_space<vmem>>, vector<1x32xf32>
      %14 = vector.broadcast %13 : vector<1x32xf32> to vector<16x32xf32>
      %15 = arith.addf %12, %14 : vector<16x32xf32>
      %c0_14 = arith.constant 0 : index
      %c0_15 = arith.constant 0 : index
      %16 = vector.load %arg6[%c0_14, %c0_15] : memref<16x32xbf16, #tpu.memory_space<vmem>>, vector<16x32xbf16>
      %17 = arith.extf %16 : vector<16x32xbf16> to vector<16x32xf32>
      %18 = arith.addf %15, %17 : vector<16x32xf32>
      %cst_16 = arith.constant dense<0.000000e+00> : vector<16xf32>
      %19 = vector.multi_reduction <add>, %18, %cst_16 [1] : vector<16x32xf32> to vector<16xf32>
      %20 = vector.shape_cast %19 : vector<16xf32> to vector<16x1xf32>
      %cst_17 = arith.constant 3.200000e+01 : f32
      %21 = vector.broadcast %cst_17 : f32 to vector<16x1xf32>
      %22 = arith.divf %20, %21 : vector<16x1xf32>
      %23 = vector.broadcast %22 : vector<16x1xf32> to vector<16x32xf32>
      %24 = arith.subf %18, %23 : vector<16x32xf32>
      %25 = arith.mulf %24, %24 : vector<16x32xf32>
      %cst_18 = arith.constant dense<0.000000e+00> : vector<16xf32>
      %26 = vector.multi_reduction <add>, %25, %cst_18 [1] : vector<16x32xf32> to vector<16xf32>
      %27 = vector.shape_cast %26 : vector<16xf32> to vector<16x1xf32>
      %cst_19 = arith.constant 3.200000e+01 : f32
      %28 = vector.broadcast %cst_19 : f32 to vector<16x1xf32>
      %29 = arith.divf %27, %28 : vector<16x1xf32>
      %30 = vector.broadcast %22 : vector<16x1xf32> to vector<16x32xf32>
      %31 = arith.subf %18, %30 : vector<16x32xf32>
      %cst_20 = arith.constant 9.99999974E-6 : f32
      %32 = vector.broadcast %cst_20 : f32 to vector<16x1xf32>
      %33 = arith.addf %29, %32 : vector<16x1xf32>
      %34 = math.rsqrt %33 : vector<16x1xf32>
      %35 = vector.broadcast %34 : vector<16x1xf32> to vector<16x32xf32>
      %36 = arith.mulf %31, %35 : vector<16x32xf32>
      %c0_21 = arith.constant 0 : index
      %c0_22 = arith.constant 0 : index
      %37 = vector.load %arg7[%c0_21, %c0_22] : memref<1x32xf32, #tpu.memory_space<vmem>>, vector<1x32xf32>
      %38 = vector.broadcast %37 : vector<1x32xf32> to vector<16x32xf32>
      %39 = arith.mulf %36, %38 : vector<16x32xf32>
      %c0_23 = arith.constant 0 : index
      %c0_24 = arith.constant 0 : index
      %40 = vector.load %arg8[%c0_23, %c0_24] : memref<1x32xf32, #tpu.memory_space<vmem>>, vector<1x32xf32>
      %41 = vector.broadcast %40 : vector<1x32xf32> to vector<16x32xf32>
      %42 = arith.addf %39, %41 : vector<16x32xf32>
      %43 = arith.truncf %42 : vector<16x32xf32> to vector<16x32xbf16>
      %c0_25 = arith.constant 0 : index
      %c0_26 = arith.constant 0 : index
      %44 = vector.load %arg9[%c0_25, %c0_26] : memref<16x32xbf16, #tpu.memory_space<vmem>>, vector<16x32xbf16>
      tpu.vector_store %arg9[%c0_25, %c0_26], %43 {strides = array<i32>} : memref<16x32xbf16, #tpu.memory_space<vmem>>, vector<16x32xbf16>,
    } else {
    }
    return
  }
  func.func @transform_0(%arg0: i32, %arg1: i32, %arg2: i32) -> (i32, i32) {
    %c0_i32 = arith.constant 0 : i32
    return %arg0, %arg2 : i32, i32
  }
  func.func @transform_1(%arg0: i32, %arg1: i32, %arg2: i32) -> (i32, i32) {
    %c0_i32 = arith.constant 0 : i32
    return %arg2, %arg1 : i32, i32
  }
  func.func @transform_2(%arg0: i32, %arg1: i32, %arg2: i32) -> (i32, i32) {
    %c0_i32 = arith.constant 0 : i32
    %c0_i32_0 = arith.constant 0 : i32
    return %c0_i32, %arg1 : i32, i32
  }
  func.func @transform_3(%arg0: i32, %arg1: i32, %arg2: i32) -> (i32, i32) {
    %c0_i32 = arith.constant 0 : i32
    return %arg0, %arg1 : i32, i32
  }
  func.func @transform_4(%arg0: i32, %arg1: i32, %arg2: i32) -> (i32, i32) {
    %c0_i32 = arith.constant 0 : i32
    %c0_i32_0 = arith.constant 0 : i32
    return %c0_i32, %arg1 : i32, i32
  }
  func.func @transform_5(%arg0: i32, %arg1: i32, %arg2: i32) -> (i32, i32) {
    %c0_i32 = arith.constant 0 : i32
    %c0_i32_0 = arith.constant 0 : i32
    return %c0_i32, %arg1 : i32, i32
  }
  func.func @transform_6(%arg0: i32, %arg1: i32, %arg2: i32) -> (i32, i32) {
    %c0_i32 = arith.constant 0 : i32
    return %arg0, %arg1 : i32, i32
  }
}

</mosaic_0001>

<bundles_post_ra>
// kernel: decoder_forward.10
= control target key start
LH: loop header
LB: loop body
LE: loop exit
PB: predicated region body
PF: predicated region fallthrough
CT: control target
= control target key end

     0   :  { %s600_s15 = smov 0   ;;  %s602_s16 = smov 0   ;;  %s644_s0 = inlined_call_operand.vmem [shape: bf16[16,16], index: 0, kind: input, shape index: {}]   ;;  %s645_s1 = inlined_call_operand.vmem [shape: bf16[16,32], index: 1, kind: input, shape index: {}]   ;;  %s646_s2 = inlined_call_operand.vmem [shape: f32[1,32], index: 2, kind: input, shape index: {}]   ;;  %s647_s3 = inlined_call_operand.vmem [shape: f32[8,32], index: 3, kind: input, shape index: {}]   ;;  %s648_s4 = inlined_call_operand.vmem [shape: bf16[16,32], index: 4, kind: output, shape index: {}]  }
   0x1   :  { %s604_s17 = smov 0  }
   0x2 LB: > { %s33_s18 = sadd.s32 1, %s567_s16  ;;  %p506_p0 = scmp.ge.s32.totalorder %s571_s17, 1  ;;  %s571_s17 = sphi %s604_s17, %s14_s17   ;;  %s567_s16 = sphi %s602_s16, %s650_s16   ;;  %s563_s15 = sphi %s600_s15, %s649_s15  }
   0x3   : > { %p35_p1 = scmp.ge.s32.totalorder %s33_s18, 2  ;;  %p220_p2 = scmp.lt.s32.totalorder %s571_s17, 3 }
   0x5   : > { %s652_s18 = smov (%p35_p1, %s33_s18), 0  ;;  %p221_p3 = pnand %p506_p0, %p220_p2 }
   0x6   : > { %p265_p4 = scmp.lt.s32.totalorder (!%p221_p3), %s563_s15, 1 }
   0x7   : > { %224 = sbr.rel (%p221_p3) target bundleno = 227 (0xe3), region = 36 }
   0xc   : > { %vm300_vm0 = vcmask 261120   ;;  %v573_v0 = vmov 0.0   ;;  %v548_v1 = vld [vmem:[%s645_s1] sm:$0xff]   ;;  %vm574_vm1 = vmmov 0   ;;  %s654_s15 = smov (!%p265_p4, %s563_s15), 1  ;;  %vm312_vm2 = vcmask 130048  }
   0xd   : > { %301 = vst.msk [vmem:[#allocation2] sm:$0xff] %vm300_vm0, %v573_v0  ;;  %516 = vmatprep.subr.bf16.mxu0 %v573_v0  ;;  %518 = vmatprep.mubr.msk.bf16.mxu0 %vm574_vm1, %v573_v0  ;;  %s507_s21 = sshll.u32 %s654_s15, 2  ;;  %v511_v9 = vld [vmem:[%s646_s2] ss:$0 sm:$0xff]  ;;  %vm374_vm3 = vcmask 257024  }
   0xe   : > { %517 = vmatpush3.bf16.msra.mxu0 %v548_v1  ;;  %s271_s24 = scalar_lea.vmem %s644_s0, %s507_s21  ;;  %v371_v11 = vld [vmem:[%s647_s3] sm:$0xff]  ;;  %s294_s5 = scalar_lea.vmem %s648_s4, %s507_s21 }
   0xf   : > { %v303_v2 = vld [vmem:[%s271_s24] sm:$0xf] }
  0x11   : > { %519 = vmatmul.mubr.msk.bf16.vlgmr.msra.gmra.mxu0 %vm312_vm2, %v303_v2 }
  0x14   : > { %v302_v3 = vld [vmem:[#allocation2] sm:$0xff] }
  0xd1   : > { %v350_v4 = vpop.f32.mrf.mxu0 }
  0xd2   : > { %v356_v5 = vadd.f32 %v350_v4, %v302_v3 }
  0xd3   : > { %v520_v6 = vpop.f32.mrf.mxu0 }
  0xd4   : > { %358 = vst.msk [vmem:[#allocation2] sm:$0xff] %vm300_vm0, %v356_v5 }
  0xd5   : > { %v353_v7 = vpop.f32.mrf.mxu0 }
  0xd7   : > { %v521_v8 = vpop.f32.mrf.mxu0 }
  0xdb   : > { %v362_v10 = vld [vmem:[#allocation2] sm:$0xff] }
  0xdc   : > { %v370_v12 = vadd.f32 %v511_v9, %v362_v10 }
  0xde   : > { %v372_v13 = vadd.f32 %v371_v11, %v370_v12 }
  0xe0   : > { %v373_v14 = vpack.c.bf16 %v372_v13, %v372_v13 }
  0xe2   : > { %375 = vst.msk [vmem:[%s294_s5] sm:$0xf] %vm374_vm3, %v373_v14 }
  0xe3 PF: > { %s14_s17 = sadd.s32 1, %s571_s17   ;;  %s649_s15 = smov %s567_s16 }
  0xe4   : > { %p11_p5 = scmp.ge.s32.totalorder %s14_s17, 4   ;;  %s650_s16 = smov %s652_s18 }
  0xe6   :  { %13 = sbr.rel (!%p11_p5) target bundleno = 2 (0x2), region = 83 }

// kernel: decoder_forward.13
= control target key start
LH: loop header
LB: loop body
LE: loop exit
PB: predicated region body
PF: predicated region fallthrough
CT: control target
= control target key end

     0   :  { %v155_v0 = vmov 0.0   ;;  %vm156_vm0 = vmmov 0   ;;  %vm46_vm1 = vcmask 261120   ;;  %s192_s1 = inlined_call_operand.vmem [shape: bf16[32,128], index: 1, kind: input, shape index: {}]   ;;  %s193_s0 = inlined_call_operand.vmem [shape: bf16[16,32], index: 0, kind: input, shape index: {}]   ;;  %s194_s2 = inlined_call_operand.vmem [shape: f32[1,128], index: 2, kind: input, shape index: {}]   ;;  %s195_s3 = inlined_call_operand.vmem [shape: bf16[16,128], index: 3, kind: output, shape index: {}]  }
   0x1   :  { %142 = vmatprep.subr.bf16.mxu0 %v155_v0  ;;  %v152_v1 = vld [vmem:[%s192_s1 + $0x8] sm:$0xff]   ;;  %146 = vmatprep.mubr.msk.bf16.mxu0 %vm156_vm0, %v155_v0  ;;  %v153_v2 = vld [vmem:[%s192_s1] sm:$0xff]  }
   0x2   :  { %143 = vmatpush3.bf16.msra.mxu0 %v152_v1  ;;  %v154_v3 = vld [vmem:[%s193_s0] sm:$0xff]  }
   0x3   :  { %144 = vmatprep.subr.bf16.mxu0 %v155_v0  ;;  %v129_v5 = vld [vmem:[%s194_s2] ss:$0 sm:$0xff] }
   0x6   :  { %145 = vmatpush3.bf16.msra.mxu0 %v153_v2 }
   0x9   :  { %147 = vmatmul.mubr.msk.bf16.vlgmr.msra.gmra.mxu0 %vm46_vm1, %v154_v3 }
  0xc9   :  { %v84_v4 = vpop.f32.mrf.mxu0 }
  0xca   :  { %v107_v7 = vadd.f32 %v129_v5, %v84_v4 }
  0xcb   :  { %v148_v6 = vpop.f32.mrf.mxu0 }
  0xcc   :  { %v109_v11 = vmax.f32 %v107_v7, 0.0 }
  0xcd   :  { %v87_v8 = vpop.f32.mrf.mxu0 }
  0xce   :  { %v108_v9 = vadd.f32 %v129_v5, %v87_v8 }
  0xcf   :  { %v149_v10 = vpop.f32.mrf.mxu0 }
  0xd0   :  { %v110_v12 = vmax.f32 %v108_v9, 0.0 }
  0xd2   :  { %v137_v13 = vpack.c.bf16 %v110_v12, %v109_v11 }
  0xd4   :  { %138 = vst [vmem:[%s195_s3] sm:$0xff] %v137_v13  }

// kernel: decoder_forward.11
= control target key start
LH: loop header
LB: loop body
LE: loop exit
PB: predicated region body
PF: predicated region fallthrough
CT: control target
= control target key end

     0   :  { %s1047_s27 = smov 0   ;;  %s1049_s28 = smov 0   ;;  %s1177_s0 = inlined_call_operand.vmem [shape: bf16[16,32], index: 0, kind: input, shape index: {}, may-alias: {0,1}]   ;;  %s1178_s1 = inlined_call_operand.vmem [shape: bf16[16,32], index: 1, kind: input, shape index: {}, may-alias: {0,1}]   ;;  %s1179_s2 = inlined_call_operand.vmem [shape: bf16[4,32,24], index: 2, kind: input, shape index: {}]   ;;  %s1180_s3 = inlined_call_operand.vmem [shape: f32[4,1,24], index: 3, kind: input, shape index: {}]   ;;  %s1181_s4 = inlined_call_operand.vmem [shape: bf16[4,8,32], index: 4, kind: input, shape index: {}]   ;;  %s1182_s5 = inlined_call_operand.vmem [shape: f32[1,32], index: 5, kind: input, shape index: {}]   ;;  %s1183_s6 = inlined_call_operand.vmem [shape: f32[1,32], index: 6, kind: input, shape index: {}]   ;;  %s1184_s7 = inlined_call_operand.vmem [shape: f32[1,32], index: 7, kind: input, shape index: {}]   ;;  %s1185_s8 = inlined_call_operand.vmem [shape: bf16[16,32], index: 8, kind: output, shape index: {}]  }
   0x1   :  { %s1051_s29 = smov 0   ;;  %s1053_s30 = smov 0  }
   0x2   :  { %s1055_s9 = smov 0  }
   0x3 LB: > { %s27_s10 = sadd.s32 1, %s988_s29  ;;  %s30_s11 = sadd.s32 1, %s992_s30  ;;  %s996_s9 = sphi %s1055_s9, %s18_s9   ;;  %s992_s30 = sphi %s1053_s30, %s1191_s30   ;;  %s988_s29 = sphi %s1051_s29, %s1190_s29   ;;  %s984_s28 = sphi %s1049_s28, %s1189_s28   ;;  %s980_s27 = sphi %s1047_s27, %s1188_s27  }
   0x4   : > { %p28_p0 = scmp.ge.s32.totalorder %s27_s10, 4  ;;  %p837_p1 = scmp.ge.s32.totalorder %s996_s9, 1 }
   0x5   : > { %p309_p2 = scmp.lt.s32.totalorder %s996_s9, 9 }
   0x6   : > { %s1193_s10 = smov (%p28_p0, %s27_s10), 0  ;;  %s1195_s11 = smov (!%p28_p0, %s30_s11), %s992_s30 }
   0x7   : > { %p310_p3 = pnand %p837_p1, %p309_p2  ;;  %p32_p4 = scmp.ge.s32.totalorder %s1195_s11, 2 }
   0x8   : > { %p365_p5 = scmp.lt.s32.totalorder (!%p310_p3), %s980_s27, 3  ;;  %p357_p6 = scmp.lt.s32.totalorder (!%p310_p3), %s984_s28, 1 }
   0x9   : > { %s1197_s11 = smov (%p32_p4, %s1195_s11), 0  ;;  %313 = sbr.rel (%p310_p3) target bundleno = 1578 (0x62a), region = 52 }
   0xa   : > { %1186 = sst [smem:[#allocation3_spill]] %s1197_s11  ;;  %s1000_s15 = smov (!%p310_p3), 120  }
   0xb   : > { %p851_p7 = scmp.ne.s32.totalorder (!%p310_p3), %s980_s27, 0 }
   0xe   : > { %v998_v0 = vmov 0.0   ;;  %s366_s12 = scalar_select %p365_p5, %s980_s27, 3  ;;  %vm999_vm0 = vmmov 0   ;;  %vm407_vm1 = vcmask 261120   ;;  %vm505_vm2 = vcmask 64512  }
   0xf   : > { %880 = vmatprep.subr.bf16.mxu1 %v998_v0  ;;  %872 = vmatprep.subr.bf16.mxu0 %v998_v0  ;;  %s1199_s28 = smov (!%p357_p6, %s984_s28), 1  ;;  %v552_v22 = vlaneseq  ;;  %vm576_vm4 = vcmask 1043456  }
  0x10   : > { %884 = vmatprep.mubr.msk.bf16.mxu1 %vm999_vm0, %v998_v0  ;;  %876 = vmatprep.mubr.msk.bf16.mxu0 %vm999_vm0, %v998_v0  ;;  %s859_s13 = sshll.u32 %s366_s12, 4  ;;  %s842_s14 = sshll.u32 %s366_s12, 2 }
  0x11   : > { %s369_s17 = scalar_lea.vmem %s1179_s2, %s859_s13  ;;  %s1093_s20 = scalar_lea.vmem %s1181_s4, %s842_s14  ;;  %v553_v23 = vshrl.u32 %v552_v22, 7  ;;  %v555_v24 = vand.u32 127, %v552_v22 }
  0x12   : > { %v950_v1 = vld [vmem:[%s369_s17 + $0x8] sm:$0xff]   ;;  %s1095_s21 = sshll.u32 %s1199_s28, 2  ;;  %s372_s24 = scalar_lea.vmem %s1180_s3, %s366_s12  ;;  %v951_v2 = vld [vmem:[%s369_s17] sm:$0xff]  }
  0x13   : > { %s380_s11 = scalar_lea.vmem %s1185_s8, %s1095_s21  ;;  %454 = vrot.lane.b32.xlu0 %v950_v1, %s1000_s15  ;;  %873 = vmatpush3.bf16.msra.mxu0 %v950_v1  ;;  %v844_v3 = vld [vmem:[%s372_s24] ss:$0 sm:$0xff]  ;;  %s360_s14 = scalar_lea.vmem %s1177_s0, %s1095_s21  ;;  %vm556_vm3 = vcmp.gt.s32.totalorder %v555_v24, %v553_v23 }
  0x14   : > { %874 = vmatprep.subr.bf16.mxu0 %v998_v0  ;;  %458 = vrot.lane.b32.xlu1 %v844_v3, %s1000_s15  ;;  %v1112_v4 = vld [vmem:[%s360_s14] sm:$0xf]  ;;  %s364_s17 = scalar_lea.vmem %s1178_s1, %s1095_s21 }
  0x15   : > { %v383_v7 = vld [vmem:[%s364_s17] sm:$0xf] }
  0x17   : > { %452 = vrot.lane.b32.xlu0 %v951_v2, %s1000_s15  ;;  %875 = vmatpush3.bf16.msra.mxu0 %v951_v2 }
  0x18   : > { %888 = vmatprep.subr.bf16.mxu0 %v998_v0 }
  0x1a   : > { %877 = vmatmul.mubr.msk.bf16.vlgmr.msra.gmra.mxu0 %vm407_vm1, %v1112_v4 }
  0x1b   : > { %890 = vmatprep.mubr.msk.bf16.mxu0 %vm999_vm0, %v998_v0 }
  0x85   : > { %v455_v5 = vpop.permute.xlu0 %454 }
  0x86   : > { %881 = vmatpush3.bf16.msra.mxu1 %v455_v5  ;;  %v459_v12 = vpop.permute.xlu1 %458 }
  0x87   : > { %882 = vmatprep.subr.bf16.mxu1 %v998_v0 }
  0x89   : > { %v453_v6 = vpop.permute.xlu0 %452 }
  0x8a   : > { %883 = vmatpush3.bf16.msra.mxu1 %v453_v6 }
  0x8b   : > { %894 = vmatprep.subr.bf16.mxu1 %v998_v0 }
  0x8d   : > { %885 = vmatmul.mubr.msk.bf16.vlgmr.msra.gmra.mxu1 %vm407_vm1, %v383_v7 }
  0x8e   : > { %896 = vmatprep.mubr.msk.bf16.mxu1 %vm999_vm0, %v998_v0 }
  0xda   : > { %v445_v8 = vpop.f32.mrf.mxu0 }
  0xdb   : > { %v446_v19 = vadd.f32 %v844_v3, %v445_v8 }
  0xdc   : > { %v878_v9 = vpop.f32.mrf.mxu0 }
  0xdd   : > { %v451_v21 = vpack.c.bf16 %v446_v19, %v446_v19 }
  0xde   : > { %v448_v10 = vpop.f32.mrf.mxu0 }
  0xe0   : > { %v879_v11 = vpop.f32.mrf.mxu0 }
 0x14d   : > { %v498_v13 = vpop.f32.mrf.mxu1 }
 0x14e   : > { %v499_v14 = vadd.f32 %v498_v13, %v459_v12 }
 0x14f   : > { %v886_v15 = vpop.f32.mrf.mxu1 }
 0x150   : > { %v504_v16 = vpack.c.bf16 %v499_v14, %v499_v14 }
 0x151   : > { %v501_v17 = vpop.f32.mrf.mxu1 }
 0x152   : > { %v510_v18 = vsel %vm505_vm2, %v504_v16, 0 }
 0x153   : > { %v887_v20 = vpop.f32.mrf.mxu1  ;;  %889 = vmatpush3.bf16.xpose.msra.mxu0 %v510_v18 }
 0x15a   : > { %891 = vmatmul.mubr.msk.bf16.vlgmr.msra.gmra.mxu0 %vm505_vm2, %v451_v21 }
 0x21a   : > { %v546_v25 = vpop.f32.mrf.mxu0 }
 0x21b   : > { %v557_v26 = vsel %vm556_vm3, -1e+30, %v546_v25 }
 0x21c   : > { %v892_v27 = vpop.f32.mrf.mxu0  ;;  %v558_v28 = vsel %vm505_vm2, %v557_v26, -inf }
 0x21d   : > { %559 = vmax.xlane.f32.xlu1 %v558_v28 }
 0x21e   : > { %v549_v29 = vpop.f32.mrf.mxu0 }
 0x220   : > { %v893_v30 = vpop.f32.mrf.mxu0 }
 0x2a6   : > { %v560_v31 = vpop.xlane.xlu1 %559 }
 0x2a7   : > { %v561_v32 = vsub.f32 %v557_v26, %v560_v31 }
 0x2a9   : > { %v562_v33 = vmul.f32 1.442695, %v561_v32 }
 0x2ab   : > { %952 = vpow2.f32 %v562_v33 }
 0x2b8   : > { %v953_v34 = vpop.eup %952 }
 0x2b9   : > { %v564_v35 = vsel %vm505_vm2, %v953_v34, 0.0 }
 0x2ba   : > { %565 = vadd.xlane.f32.xlu0 %v564_v35 }
 0x2d0   : > { %571 = vrot.lane.b32.xlu0 %v504_v16, %s1000_s15 }
 0x343   : > { %v566_v36 = vpop.xlane.xlu0 %565 }
 0x344   : > { %954 = vrcp.f32 %v566_v36 }
 0x347   : > { %v572_v37 = vpop.permute.xlu0 %571 }
 0x348   : > { %v578_v38 = vsel %vm576_vm4, %v572_v37, 0 }
 0x349   : > { %895 = vmatpush3.bf16.msra.mxu1 %v578_v38 }
 0x351   : > { %v955_v39 = vpop.eup %954 }
 0x352   : > { %v568_v40 = vmul.f32 %v955_v39, %v953_v34 }
 0x354   : > { %v569_v41 = vpack.c.bf16 %v568_v40, %v568_v40 }
 0x356   : > { %897 = vmatmul.mubr.msk.bf16.vlgmr.msra.gmra.mxu1 %vm505_vm2, %v569_v41 }
 0x416   : > { %v614_v42 = vpop.f32.mrf.mxu1 }
 0x418   : > { %v898_v43 = vpop.f32.mrf.mxu1  ;;  %623 = sbr.rel (%p851_p7) target bundleno = 1055 (0x41f), region = 56 }
 0x41a   : > { %v617_v44 = vpop.f32.mrf.mxu1 }
 0x41c   : > { %v899_v45 = vpop.f32.mrf.mxu1 }
 0x41d   : > { %v1001_v46 = vmov 0.0  }
 0x41e   : > { %624 = vst.msk [vmem:[#allocation2] sm:$0xff] %vm407_vm1, %v1001_v46 }
 0x41f PF: > { %900 = vmatprep.subr.bf16.mxu0 %v998_v0  ;;  %v627_v47 = vld [vmem:[%s1093_s20] sm:$0xf]  ;;  %902 = vmatprep.mubr.msk.bf16.mxu0 %vm999_vm0, %v998_v0  ;;  %v626_v49 = vpack.c.bf16 %v614_v42, %v614_v42  ;;  %p853_p8 = scmp.ne.s32.totalorder %s980_s27, 3 }
 0x420   : > { %v632_v48 = vsel %vm576_vm4, %v627_v47, 0 }
 0x421   : > { %901 = vmatpush3.bf16.msra.mxu0 %v632_v48 }
 0x424   : > { %903 = vmatmul.mubr.msk.bf16.vlgmr.msra.gmra.mxu0 %vm505_vm2, %v626_v49 }
 0x425   : > { %v625_v50 = vld [vmem:[#allocation2] sm:$0xff] }
 0x4e4   : > { %v668_v51 = vpop.f32.mrf.mxu0 }
 0x4e5   : > { %v674_v52 = vadd.f32 %v668_v51, %v625_v50 }
 0x4e6   : > { %v904_v53 = vpop.f32.mrf.mxu0  ;;  %679 = sbr.rel (%p853_p8) target bundleno = 1578 (0x62a), region = 60 }
 0x4e7   : > { %675 = vst.msk [vmem:[#allocation2] sm:$0xff] %vm407_vm1, %v674_v52 }
 0x4e8   : > { %v671_v54 = vpop.f32.mrf.mxu0 }
 0x4ea   : > { %v905_v55 = vpop.f32.mrf.mxu0 }
 0x4eb   : > { %v854_v57 = vld [vmem:[%s1182_s5] ss:$0 sm:$0xff]  ;;  %v689_v58 = vunpack.c.l.bf16 %v1112_v4  ;;  %vm722_vm5 = vcmask 257024  }
 0x4ec   : > { %v855_v4 = vld [vmem:[%s1183_s6] ss:$0 sm:$0xff] }
 0x4ed   : > { %v856_v9 = vld [vmem:[%s1184_s7] ss:$0 sm:$0xff] }
 0x4ee   : > { %v680_v56 = vld [vmem:[#allocation2] sm:$0xff] }
 0x4ef   : > { %v688_v59 = vadd.f32 %v854_v57, %v680_v56 }
 0x4f1   : > { %v690_v60 = vadd.f32 %v689_v58, %v688_v59 }
 0x4f3   : > { %v691_v61 = vsel %vm407_vm1, %v690_v60, 0.0 }
 0x4f4   : > { %692 = vadd.xlane.f32.xlu0 %v691_v61 }
 0x57d   : > { %v693_v62 = vpop.xlane.xlu0 %692 }
 0x57e   : > { %v695_v63 = vmul.f32 0.03125, %v693_v62 }
 0x580   : > { %v696_v0 = vsub.f32 %v690_v60, %v695_v63 }
 0x582   : > { %v697_v1 = vmul.f32 %v696_v0, %v696_v0 }
 0x584   : > { %v698_v2 = vsel %vm407_vm1, %v697_v1, 0.0 }
 0x585   : > { %699 = vadd.xlane.f32.xlu0 %v698_v2 }
 0x60e   : > { %v700_v3 = vpop.xlane.xlu0 %699 }
 0x60f   : > { %v701_v5 = vmul.f32 0.03125, %v700_v3 }
 0x611   : > { %v702_v6 = vadd.f32 1e-05, %v701_v5 }
 0x613   : > { %956 = vrsqrt.f32 %v702_v6 }
 0x620   : > { %v957_v7 = vpop.eup %956 }
 0x621   : > { %v704_v8 = vmul.f32 %v957_v7, %v696_v0 }
 0x623   : > { %v712_v10 = vmul.f32 %v855_v4, %v704_v8 }
 0x625   : > { %v720_v11 = vadd.f32 %v856_v9, %v712_v10 }
 0x627   : > { %v721_v12 = vpack.c.bf16 %v720_v11, %v720_v11 }
 0x629   : > { %723 = vst.msk [vmem:[%s380_s11] sm:$0xf] %vm722_vm5, %v721_v12 }
 0x62a PF: > { %s18_s9 = sadd.s32 1, %s996_s9   ;;  %s1187_s26 = sld [smem:[#allocation3_spill]] }
 0x62b   : > { %p15_p9 = scmp.ge.s32.totalorder %s18_s9, 10   ;;  %s1188_s27 = smov %s988_s29 }
 0x62c   : > { %s1189_s28 = smov %s992_s30  ;;  %s1190_s29 = smov %s1193_s10 }
 0x62d   :  { %17 = sbr.rel (!%p15_p9) target bundleno = 3 (0x3), region = 102 }
 0x630   : > { %s1191_s30 = smov %s1187_s26 }

// kernel: decoder_forward.12
= control target key start
LH: loop header
LB: loop body
LE: loop exit
PB: predicated region body
PF: predicated region fallthrough
CT: control target
= control target key end

     0   :  { %s1041_s27 = smov 0   ;;  %s1043_s28 = smov 0   ;;  %s1171_s0 = inlined_call_operand.vmem [shape: bf16[16,32], index: 0, kind: input, shape index: {}]   ;;  %s1172_s1 = inlined_call_operand.vmem [shape: bf16[16,32], index: 1, kind: input, shape index: {}]   ;;  %s1173_s2 = inlined_call_operand.vmem [shape: bf16[4,32,24], index: 2, kind: input, shape index: {}]   ;;  %s1174_s3 = inlined_call_operand.vmem [shape: f32[4,1,24], index: 3, kind: input, shape index: {}]   ;;  %s1175_s4 = inlined_call_operand.vmem [shape: bf16[4,8,32], index: 4, kind: input, shape index: {}]   ;;  %s1176_s5 = inlined_call_operand.vmem [shape: f32[1,32], index: 5, kind: input, shape index: {}]   ;;  %s1177_s6 = inlined_call_operand.vmem [shape: f32[1,32], index: 6, kind: input, shape index: {}]   ;;  %s1178_s7 = inlined_call_operand.vmem [shape: f32[1,32], index: 7, kind: input, shape index: {}]   ;;  %s1179_s8 = inlined_call_operand.vmem [shape: bf16[16,32], index: 8, kind: output, shape index: {}]  }
   0x1   :  { %s1045_s29 = smov 0   ;;  %s1047_s30 = smov 0  }
   0x2   :  { %s1049_s9 = smov 0  }
   0x3 LB: > { %s27_s10 = sadd.s32 1, %s982_s29  ;;  %s30_s11 = sadd.s32 1, %s986_s30  ;;  %s990_s9 = sphi %s1049_s9, %s18_s9   ;;  %s986_s30 = sphi %s1047_s30, %s1185_s30   ;;  %s982_s29 = sphi %s1045_s29, %s1184_s29   ;;  %s978_s28 = sphi %s1043_s28, %s1183_s28   ;;  %s974_s27 = sphi %s1041_s27, %s1182_s27  }
   0x4   : > { %p28_p0 = scmp.ge.s32.totalorder %s27_s10, 4  ;;  %p831_p1 = scmp.ge.s32.totalorder %s990_s9, 1 }
   0x5   : > { %p309_p2 = scmp.lt.s32.totalorder %s990_s9, 9 }
   0x6   : > { %s1187_s10 = smov (%p28_p0, %s27_s10), 0  ;;  %s1189_s11 = smov (!%p28_p0, %s30_s11), %s986_s30 }
   0x7   : > { %p310_p3 = pnand %p831_p1, %p309_p2  ;;  %p32_p4 = scmp.ge.s32.totalorder %s1189_s11, 2 }
   0x8   : > { %p365_p5 = scmp.lt.s32.totalorder (!%p310_p3), %s974_s27, 3  ;;  %p357_p6 = scmp.lt.s32.totalorder (!%p310_p3), %s978_s28, 1 }
   0x9   : > { %s1191_s11 = smov (%p32_p4, %s1189_s11), 0  ;;  %313 = sbr.rel (%p310_p3) target bundleno = 1577 (0x629), region = 52 }
   0xa   : > { %1180 = sst [smem:[#allocation3_spill]] %s1191_s11  ;;  %s994_s15 = smov (!%p310_p3), 120  }
   0xb   : > { %p845_p7 = scmp.ne.s32.totalorder (!%p310_p3), %s974_s27, 0 }
   0xe   : > { %v992_v0 = vmov 0.0   ;;  %s366_s12 = scalar_select %p365_p5, %s974_s27, 3  ;;  %vm993_vm0 = vmmov 0   ;;  %vm407_vm1 = vcmask 261120   ;;  %vm505_vm2 = vcmask 64512  }
   0xf   : > { %874 = vmatprep.subr.bf16.mxu1 %v992_v0  ;;  %866 = vmatprep.subr.bf16.mxu0 %v992_v0  ;;  %s1193_s28 = smov (!%p357_p6, %s978_s28), 1  ;;  %vm570_vm3 = vcmask 1043456  }
  0x10   : > { %878 = vmatprep.mubr.msk.bf16.mxu1 %vm993_vm0, %v992_v0  ;;  %870 = vmatprep.mubr.msk.bf16.mxu0 %vm993_vm0, %v992_v0  ;;  %s853_s13 = sshll.u32 %s366_s12, 4  ;;  %s836_s14 = sshll.u32 %s366_s12, 2 }
  0x11   : > { %s369_s17 = scalar_lea.vmem %s1173_s2, %s853_s13  ;;  %s1087_s20 = scalar_lea.vmem %s1175_s4, %s836_s14 }
  0x12   : > { %v944_v1 = vld [vmem:[%s369_s17 + $0x8] sm:$0xff]   ;;  %s1089_s21 = sshll.u32 %s1193_s28, 2  ;;  %s372_s24 = scalar_lea.vmem %s1174_s3, %s366_s12  ;;  %v945_v2 = vld [vmem:[%s369_s17] sm:$0xff]  }
  0x13   : > { %s380_s11 = scalar_lea.vmem %s1179_s8, %s1089_s21  ;;  %454 = vrot.lane.b32.xlu0 %v944_v1, %s994_s15  ;;  %867 = vmatpush3.bf16.msra.mxu0 %v944_v1  ;;  %v838_v3 = vld [vmem:[%s372_s24] ss:$0 sm:$0xff]  ;;  %s360_s14 = scalar_lea.vmem %s1171_s0, %s1089_s21 }
  0x14   : > { %868 = vmatprep.subr.bf16.mxu0 %v992_v0  ;;  %458 = vrot.lane.b32.xlu1 %v838_v3, %s994_s15  ;;  %v1106_v4 = vld [vmem:[%s360_s14] sm:$0xf]  ;;  %s364_s17 = scalar_lea.vmem %s1172_s1, %s1089_s21 }
  0x15   : > { %v383_v7 = vld [vmem:[%s364_s17] sm:$0xf] }
  0x17   : > { %452 = vrot.lane.b32.xlu0 %v945_v2, %s994_s15  ;;  %869 = vmatpush3.bf16.msra.mxu0 %v945_v2 }
  0x18   : > { %882 = vmatprep.subr.bf16.mxu0 %v992_v0 }
  0x1a   : > { %871 = vmatmul.mubr.msk.bf16.vlgmr.msra.gmra.mxu0 %vm407_vm1, %v1106_v4 }
  0x1b   : > { %884 = vmatprep.mubr.msk.bf16.mxu0 %vm993_vm0, %v992_v0 }
  0x85   : > { %v455_v5 = vpop.permute.xlu0 %454 }
  0x86   : > { %875 = vmatpush3.bf16.msra.mxu1 %v455_v5  ;;  %v459_v12 = vpop.permute.xlu1 %458 }
  0x87   : > { %876 = vmatprep.subr.bf16.mxu1 %v992_v0 }
  0x89   : > { %v453_v6 = vpop.permute.xlu0 %452 }
  0x8a   : > { %877 = vmatpush3.bf16.msra.mxu1 %v453_v6 }
  0x8b   : > { %888 = vmatprep.subr.bf16.mxu1 %v992_v0 }
  0x8d   : > { %879 = vmatmul.mubr.msk.bf16.vlgmr.msra.gmra.mxu1 %vm407_vm1, %v383_v7 }
  0x8e   : > { %890 = vmatprep.mubr.msk.bf16.mxu1 %vm993_vm0, %v992_v0 }
  0xda   : > { %v445_v8 = vpop.f32.mrf.mxu0 }
  0xdb   : > { %v446_v19 = vadd.f32 %v838_v3, %v445_v8 }
  0xdc   : > { %v872_v9 = vpop.f32.mrf.mxu0 }
  0xdd   : > { %v451_v21 = vpack.c.bf16 %v446_v19, %v446_v19 }
  0xde   : > { %v448_v10 = vpop.f32.mrf.mxu0 }
  0xe0   : > { %v873_v11 = vpop.f32.mrf.mxu0 }
 0x14d   : > { %v498_v13 = vpop.f32.mrf.mxu1 }
 0x14e   : > { %v499_v14 = vadd.f32 %v498_v13, %v459_v12 }
 0x14f   : > { %v880_v15 = vpop.f32.mrf.mxu1 }
 0x150   : > { %v504_v16 = vpack.c.bf16 %v499_v14, %v499_v14 }
 0x151   : > { %v501_v17 = vpop.f32.mrf.mxu1 }
 0x152   : > { %v510_v18 = vsel %vm505_vm2, %v504_v16, 0 }
 0x153   : > { %v881_v20 = vpop.f32.mrf.mxu1  ;;  %883 = vmatpush3.bf16.xpose.msra.mxu0 %v510_v18 }
 0x15a   : > { %885 = vmatmul.mubr.msk.bf16.vlgmr.msra.gmra.mxu0 %vm505_vm2, %v451_v21 }
 0x21a   : > { %v546_v22 = vpop.f32.mrf.mxu0 }
 0x21b   : > { %v552_v23 = vsel %vm505_vm2, %v546_v22, -inf }
 0x21c   : > { %553 = vmax.xlane.f32.xlu1 %v552_v23  ;;  %v886_v24 = vpop.f32.mrf.mxu0 }
 0x21e   : > { %v549_v25 = vpop.f32.mrf.mxu0 }
 0x220   : > { %v887_v26 = vpop.f32.mrf.mxu0 }
 0x2a5   : > { %v554_v27 = vpop.xlane.xlu1 %553 }
 0x2a6   : > { %v555_v28 = vsub.f32 %v546_v22, %v554_v27 }
 0x2a8   : > { %v556_v29 = vmul.f32 1.442695, %v555_v28 }
 0x2aa   : > { %946 = vpow2.f32 %v556_v29 }
 0x2b7   : > { %v947_v30 = vpop.eup %946 }
 0x2b8   : > { %v558_v31 = vsel %vm505_vm2, %v947_v30, 0.0 }
 0x2b9   : > { %559 = vadd.xlane.f32.xlu0 %v558_v31 }
 0x2cf   : > { %565 = vrot.lane.b32.xlu0 %v504_v16, %s994_s15 }
 0x342   : > { %v560_v32 = vpop.xlane.xlu0 %559 }
 0x343   : > { %948 = vrcp.f32 %v560_v32 }
 0x346   : > { %v566_v33 = vpop.permute.xlu0 %565 }
 0x347   : > { %v572_v34 = vsel %vm570_vm3, %v566_v33, 0 }
 0x348   : > { %889 = vmatpush3.bf16.msra.mxu1 %v572_v34 }
 0x350   : > { %v949_v35 = vpop.eup %948 }
 0x351   : > { %v562_v36 = vmul.f32 %v949_v35, %v947_v30 }
 0x353   : > { %v563_v37 = vpack.c.bf16 %v562_v36, %v562_v36 }
 0x355   : > { %891 = vmatmul.mubr.msk.bf16.vlgmr.msra.gmra.mxu1 %vm505_vm2, %v563_v37 }
 0x415   : > { %v608_v38 = vpop.f32.mrf.mxu1 }
 0x417   : > { %v892_v39 = vpop.f32.mrf.mxu1  ;;  %617 = sbr.rel (%p845_p7) target bundleno = 1054 (0x41e), region = 56 }
 0x419   : > { %v611_v40 = vpop.f32.mrf.mxu1 }
 0x41b   : > { %v893_v41 = vpop.f32.mrf.mxu1 }
 0x41c   : > { %v995_v42 = vmov 0.0  }
 0x41d   : > { %618 = vst.msk [vmem:[#allocation2] sm:$0xff] %vm407_vm1, %v995_v42 }
 0x41e PF: > { %894 = vmatprep.subr.bf16.mxu0 %v992_v0  ;;  %v621_v43 = vld [vmem:[%s1087_s20] sm:$0xf]  ;;  %896 = vmatprep.mubr.msk.bf16.mxu0 %vm993_vm0, %v992_v0  ;;  %v620_v45 = vpack.c.bf16 %v608_v38, %v608_v38  ;;  %p847_p8 = scmp.ne.s32.totalorder %s974_s27, 3 }
 0x41f   : > { %v626_v44 = vsel %vm570_vm3, %v621_v43, 0 }
 0x420   : > { %895 = vmatpush3.bf16.msra.mxu0 %v626_v44 }
 0x423   : > { %897 = vmatmul.mubr.msk.bf16.vlgmr.msra.gmra.mxu0 %vm505_vm2, %v620_v45 }
 0x424   : > { %v619_v46 = vld [vmem:[#allocation2] sm:$0xff] }
 0x4e3   : > { %v662_v47 = vpop.f32.mrf.mxu0 }
 0x4e4   : > { %v668_v48 = vadd.f32 %v662_v47, %v619_v46 }
 0x4e5   : > { %v898_v49 = vpop.f32.mrf.mxu0  ;;  %673 = sbr.rel (%p847_p8) target bundleno = 1577 (0x629), region = 60 }
 0x4e6   : > { %669 = vst.msk [vmem:[#allocation2] sm:$0xff] %vm407_vm1, %v668_v48 }
 0x4e7   : > { %v665_v50 = vpop.f32.mrf.mxu0 }
 0x4e9   : > { %v899_v51 = vpop.f32.mrf.mxu0 }
 0x4ea   : > { %v848_v53 = vld [vmem:[%s1176_s5] ss:$0 sm:$0xff]  ;;  %v683_v54 = vunpack.c.l.bf16 %v1106_v4  ;;  %vm716_vm4 = vcmask 257024  }
 0x4eb   : > { %v849_v3 = vld [vmem:[%s1177_s6] ss:$0 sm:$0xff] }
 0x4ec   : > { %v850_v5 = vld [vmem:[%s1178_s7] ss:$0 sm:$0xff] }
 0x4ed   : > { %v674_v52 = vld [vmem:[#allocation2] sm:$0xff] }
 0x4ee   : > { %v682_v55 = vadd.f32 %v848_v53, %v674_v52 }
 0x4f0   : > { %v684_v56 = vadd.f32 %v683_v54, %v682_v55 }
 0x4f2   : > { %v685_v57 = vsel %vm407_vm1, %v684_v56, 0.0 }
 0x4f3   : > { %686 = vadd.xlane.f32.xlu0 %v685_v57 }
 0x57c   : > { %v687_v58 = vpop.xlane.xlu0 %686 }
 0x57d   : > { %v689_v59 = vmul.f32 0.03125, %v687_v58 }
 0x57f   : > { %v690_v60 = vsub.f32 %v684_v56, %v689_v59 }
 0x581   : > { %v691_v61 = vmul.f32 %v690_v60, %v690_v60 }
 0x583   : > { %v692_v62 = vsel %vm407_vm1, %v691_v61, 0.0 }
 0x584   : > { %693 = vadd.xlane.f32.xlu0 %v692_v62 }
 0x60d   : > { %v694_v63 = vpop.xlane.xlu0 %693 }
 0x60e   : > { %v695_v0 = vmul.f32 0.03125, %v694_v63 }
 0x610   : > { %v696_v1 = vadd.f32 1e-05, %v695_v0 }
 0x612   : > { %950 = vrsqrt.f32 %v696_v1 }
 0x61f   : > { %v951_v2 = vpop.eup %950 }
 0x620   : > { %v698_v4 = vmul.f32 %v951_v2, %v690_v60 }
 0x622   : > { %v706_v6 = vmul.f32 %v849_v3, %v698_v4 }
 0x624   : > { %v714_v7 = vadd.f32 %v850_v5, %v706_v6 }
 0x626   : > { %v715_v8 = vpack.c.bf16 %v714_v7, %v714_v7 }
 0x628   : > { %717 = vst.msk [vmem:[%s380_s11] sm:$0xf] %vm716_vm4, %v715_v8 }
 0x629 PF: > { %s18_s9 = sadd.s32 1, %s990_s9   ;;  %s1181_s26 = sld [smem:[#allocation3_spill]] }
 0x62a   : > { %p15_p9 = scmp.ge.s32.totalorder %s18_s9, 10   ;;  %s1182_s27 = smov %s982_s29 }
 0x62b   : > { %s1183_s28 = smov %s986_s30  ;;  %s1184_s29 = smov %s1187_s10 }
 0x62c   :  { %17 = sbr.rel (!%p15_p9) target bundleno = 3 (0x3), region = 102 }
 0x62f   : > { %s1185_s30 = smov %s1181_s26 }

// kernel: decoder_forward.19
= control target key start
LH: loop header
LB: loop body
LE: loop exit
PB: predicated region body
PF: predicated region fallthrough
CT: control target
= control target key end

     0   :  { %v176_v1 = vmov 0.0   ;;  %vm177_vm0 = vmmov 0   ;;  %vm20_vm1 = vcmask 130048   ;;  %s222_s0 = inlined_call_operand.vmem [shape: bf16[16,32], index: 0, kind: input, shape index: {}]   ;;  %s223_s1 = inlined_call_operand.vmem [shape: bf16[32,16], index: 1, kind: input, shape index: {}]   ;;  %s224_s2 = inlined_call_operand.vmem [shape: f32[1,16], index: 2, kind: input, shape index: {}]   ;;  %s225_s3 = inlined_call_operand.hbm [shape: f32[16,16], index: 3, kind: output, shape index: {}]  }
   0x1   :  { %v151_v0 = vld [vmem:[%s223_s1 + $0x8] sm:$0xff]   ;;  %138 = vmatprep.subr.bf16.mxu0 %v176_v1  ;;  %v152_v2 = vld [vmem:[%s223_s1] sm:$0xff]   ;;  %142 = vmatprep.mubr.msk.bf16.mxu0 %vm177_vm0, %v176_v1 }
   0x2   :  { %139 = vmatpush3.bf16.msra.mxu0 %v151_v0 }
   0x3   :  { %140 = vmatprep.subr.bf16.mxu0 %v176_v1 }
   0x4   :  { %8 = vsyncpa [#allocation4], 0  ;;  %21 = vst.msk [vmem:[#allocation2] sm:$0xff] %vm20_vm1, %v176_v1  ;;  %v153_v3 = vld [vmem:[%s222_s0] sm:$0xff]   ;;  %vm48_vm2 = vcmask 261120   ;;  %s178_s0 = smov [#allocation3]  }
   0x5   :  { %22 = vst.msk [vmem:[#allocation2 + $0x8] sm:$0xff] %vm20_vm1, %v176_v1  ;;  %v134_v12 = vld [vmem:[%s224_s2] ss:$0 sm:$0xff]  ;;  %s119_s19 = sshll.u32 %s178_s0, 4  ;;  %s120_s19 = int_to_ptr.vmem [resolvable:$true] %s119_s19 }
   0x6   :  { %141 = vmatpush3.bf16.msra.mxu0 %v152_v2  ;;  %s154_s20 = scalar_lea.vmem %s120_s19, 256  ;;  %p159_p1 = scmp.lt.s32.totalorder %s120_s19, %s120_s19 }
   0x7   :  { %p155_p0 = scmp.ne.s32.totalorder %s120_s19, %s154_s20  ;;  %p160_p2 = scmp.lt.s32.totalorder %s154_s20, %s154_s20 }
   0x9   :  { %143 = vmatmul.mubr.msk.bf16.vlgmr.msra.gmra.mxu0 %vm48_vm2, %v153_v3  ;;  %p161_p3 = por %p160_p2, %p159_p1 }
   0xb   :  { %v23_v4 = vld [vmem:[#allocation2] sm:$0xff]  ;;  %p162_p4 = pnand %p161_p3, %p155_p0 }
   0xc   :  { %v24_v8 = vld [vmem:[#allocation2 + $0x8] sm:$0xff] }
  0xc9   :  { %v86_v5 = vpop.f32.mrf.mxu0 }
  0xca   :  { %v93_v6 = vadd.f32 %v86_v5, %v23_v4 }
  0xcb   :  { %v144_v7 = vpop.f32.mrf.mxu0 }
  0xcc   :  { %96 = vst.msk [vmem:[#allocation2] sm:$0xff] %vm20_vm1, %v93_v6 }
  0xcd   :  { %v89_v9 = vpop.f32.mrf.mxu0 }
  0xce   :  { %v94_v10 = vadd.f32 %v89_v9, %v24_v8 }
  0xcf   :  { %v145_v11 = vpop.f32.mrf.mxu0 }
  0xd0   :  { %97 = vst.msk [vmem:[#allocation2 + $0x8] sm:$0xff] %vm20_vm1, %v94_v10 }
  0xd3   :  { %v101_v13 = vld [vmem:[#allocation2] sm:$0xff] }
  0xd4   :  { %v110_v14 = vadd.f32 %v134_v12, %v101_v13 }
  0xd6   :  { %112 = vst.msk [vmem:[#allocation3] sm:$0xff] %vm20_vm1, %v110_v14 }
  0xd7   :  { %v102_v15 = vld [vmem:[#allocation2 + $0x8] sm:$0xff] }
  0xd8   :  { %v111_v16 = vadd.f32 %v134_v12, %v102_v15 }
  0xda   :  { %113 = vst.msk [vmem:[#allocation3 + $0x8] sm:$0xff] %vm20_vm1, %v111_v16 }
  0xdb   :  { %165 = shalt.err (!%p162_p4)
}
  0xdc   :  { %s179_s21 = smov 128   ;;  %s180_s2 = smov 8  }
  0xdd   :  { %125 = dma.vmem_to_hbm [thread:$0]  %s120_s19, 256, %s225_s3, [#allocation4], %s179_s21, %s179_s21, %s180_s2  }
  0xde   :  { %174 = dma.done.wait [#allocation4], 256  }
  0xdf   :  { %175 = vsyncadd [#allocation4], 4294967040 }
  0xe0   :  { %129 = vsyncpa [#allocation4], 1 }

// kernel: decoder_forward.14
= control target key start
LH: loop header
LB: loop body
LE: loop exit
PB: predicated region body
PF: predicated region fallthrough
CT: control target
= control target key end

     0   :  { %vm28_vm0 = vcmask 261120   ;;  %v295_v0 = vmov 0.0   ;;  %vm296_vm1 = vmmov 0   ;;  %vm224_vm2 = vcmask 257024   ;;  %s385_s1 = inlined_call_operand.vmem [shape: bf16[128,32], index: 1, kind: input, shape index: {}]   ;;  %s386_s0 = inlined_call_operand.vmem [shape: bf16[16,128], index: 0, kind: input, shape index: {}]   ;;  %s387_s3 = inlined_call_operand.vmem [shape: bf16[16,32], index: 3, kind: input, shape index: {}]   ;;  %s388_s2 = inlined_call_operand.vmem [shape: f32[1,32], index: 2, kind: input, shape index: {}]   ;;  %s389_s4 = inlined_call_operand.vmem [shape: f32[1,32], index: 4, kind: input, shape index: {}]   ;;  %s390_s5 = inlined_call_operand.vmem [shape: f32[1,32], index: 5, kind: input, shape index: {}]   ;;  %s391_s6 = inlined_call_operand.vmem [shape: bf16[16,32], index: 6, kind: output, shape index: {}]  }
   0x1   :  { %260 = vmatprep.subr.bf16.mxu0 %v295_v0  ;;  %v282_v1 = vld [vmem:[%s385_s1 + $0x38] sm:$0xff]   ;;  %276 = vmatprep.mubr.msk.bf16.mxu0 %vm296_vm1, %v295_v0  ;;  %29 = vst.msk [vmem:[#allocation2] sm:$0xff] %vm28_vm0, %v295_v0  ;;  %30 = vst.msk [vmem:[#allocation2 + $0x8] sm:$0xff] %vm28_vm0, %v295_v0  ;;  %v283_v2 = vld [vmem:[%s385_s1 + $0x30] sm:$0xff]  }
   0x2   :  { %261 = vmatpush3.bf16.msra.mxu0 %v282_v1  ;;  %v284_v3 = vld [vmem:[%s385_s1 + $0x28] sm:$0xff]   ;;  %v285_v4 = vld [vmem:[%s385_s1 + $0x20] sm:$0xff]   ;;  %v286_v5 = vld [vmem:[%s385_s1 + $0x18] sm:$0xff]  }
   0x3   :  { %262 = vmatprep.subr.bf16.mxu0 %v295_v0  ;;  %v287_v6 = vld [vmem:[%s385_s1 + $0x10] sm:$0xff]   ;;  %v288_v7 = vld [vmem:[%s385_s1 + $0x8] sm:$0xff]   ;;  %v289_v8 = vld [vmem:[%s385_s1] sm:$0xff]  }
   0x4   :  { %v290_v9 = vld [vmem:[%s386_s0] sm:$0xff]  }
   0x5   :  { %v248_v18 = vld [vmem:[%s387_s3] sm:$0xff]  }
   0x6   :  { %263 = vmatpush3.bf16.msra.mxu0 %v283_v2  ;;  %v240_v19 = vld [vmem:[%s388_s2] ss:$0 sm:$0xff]  ;;  %v249_v20 = vunpack.c.l.bf16 %v248_v18  ;;  %v250_v24 = vunpack.c.h.bf16 %v248_v18 }
   0x7   :  { %264 = vmatprep.subr.bf16.mxu0 %v295_v0  ;;  %v241_v47 = vld [vmem:[%s389_s4] ss:$0 sm:$0xff] }
   0x8   :  { %v31_v10 = vld [vmem:[#allocation2] sm:$0xff]  ;;  %v32_v14 = vld [vmem:[#allocation2 + $0x8] sm:$0xff] }
   0x9   :  { %v242_v49 = vld [vmem:[%s390_s5] ss:$0 sm:$0xff] }
   0xa   :  { %265 = vmatpush3.bf16.msra.mxu0 %v284_v3 }
   0xb   :  { %266 = vmatprep.subr.bf16.mxu0 %v295_v0 }
   0xe   :  { %267 = vmatpush3.bf16.msra.mxu0 %v285_v4 }
   0xf   :  { %268 = vmatprep.subr.bf16.mxu0 %v295_v0 }
  0x12   :  { %269 = vmatpush3.bf16.msra.mxu0 %v286_v5 }
  0x13   :  { %270 = vmatprep.subr.bf16.mxu0 %v295_v0 }
  0x16   :  { %271 = vmatpush3.bf16.msra.mxu0 %v287_v6 }
  0x17   :  { %272 = vmatprep.subr.bf16.mxu0 %v295_v0 }
  0x1a   :  { %273 = vmatpush3.bf16.msra.mxu0 %v288_v7 }
  0x1b   :  { %274 = vmatprep.subr.bf16.mxu0 %v295_v0 }
  0x1e   :  { %275 = vmatpush3.bf16.msra.mxu0 %v289_v8 }
  0x21   :  { %277 = vmatmul.mubr.bf16.vlgmr.msra.gmra.mxu0 %v290_v9 }
  0xe1   :  { %v139_v11 = vpop.f32.mrf.mxu0 }
  0xe2   :  { %v146_v12 = vadd.f32 %v139_v11, %v31_v10 }
  0xe3   :  { %v278_v13 = vpop.f32.mrf.mxu0 }
  0xe4   :  { %149 = vst.msk [vmem:[#allocation2] sm:$0xff] %vm28_vm0, %v146_v12 }
  0xe5   :  { %v142_v15 = vpop.f32.mrf.mxu0 }
  0xe6   :  { %v147_v16 = vadd.f32 %v142_v15, %v32_v14 }
  0xe7   :  { %v279_v17 = vpop.f32.mrf.mxu0 }
  0xe8   :  { %150 = vst.msk [vmem:[#allocation2 + $0x8] sm:$0xff] %vm28_vm0, %v147_v16 }
  0xeb   :  { %v154_v21 = vld [vmem:[#allocation2] sm:$0xff] }
  0xec   :  { %v163_v22 = vadd.f32 %v240_v19, %v154_v21 }
  0xee   :  { %v169_v23 = vadd.f32 %v249_v20, %v163_v22 }
  0xef   :  { %v155_v25 = vld [vmem:[#allocation2 + $0x8] sm:$0xff] }
  0xf0   :  { %v171_v26 = vsel %vm28_vm0, %v169_v23, 0.0  ;;  %v164_v27 = vadd.f32 %v240_v19, %v155_v25 }
  0xf1   :  { %172 = vadd.xlane.f32.xlu0 %v171_v26 }
  0xf2   :  { %v170_v28 = vadd.f32 %v250_v24, %v164_v27 }
  0xf4   :  { %v174_v29 = vsel %vm28_vm0, %v170_v28, 0.0 }
  0xf5   :  { %175 = vadd.xlane.f32.xlu0 %v174_v29 }
 0x17a   :  { %v173_v30 = vpop.xlane.xlu0 %172 }
 0x17b   :  { %v178_v31 = vmul.f32 0.03125, %v173_v30 }
 0x17d   :  { %v180_v32 = vsub.f32 %v169_v23, %v178_v31 }
 0x17e   :  { %v176_v33 = vpop.xlane.xlu0 %175 }
 0x17f   :  { %v179_v34 = vmul.f32 0.03125, %v176_v33  ;;  %v182_v35 = vmul.f32 %v180_v32, %v180_v32 }
 0x181   :  { %v181_v36 = vsub.f32 %v170_v28, %v179_v34  ;;  %v184_v37 = vsel %vm28_vm0, %v182_v35, 0.0 }
 0x182   :  { %185 = vadd.xlane.f32.xlu1 %v184_v37 }
 0x183   :  { %v183_v38 = vmul.f32 %v181_v36, %v181_v36 }
 0x185   :  { %v187_v39 = vsel %vm28_vm0, %v183_v38, 0.0 }
 0x186   :  { %188 = vadd.xlane.f32.xlu1 %v187_v39 }
 0x20b   :  { %v186_v40 = vpop.xlane.xlu1 %185 }
 0x20c   :  { %v190_v41 = vmul.f32 0.03125, %v186_v40 }
 0x20e   :  { %v192_v42 = vadd.f32 1e-05, %v190_v41 }
 0x20f   :  { %v189_v43 = vpop.xlane.xlu1 %188 }
 0x210   :  { %291 = vrsqrt.f32 %v192_v42  ;;  %v191_v44 = vmul.f32 0.03125, %v189_v43 }
 0x212   :  { %v193_v45 = vadd.f32 1e-05, %v191_v44 }
 0x214   :  { %293 = vrsqrt.f32 %v193_v45 }
 0x21d   :  { %v292_v46 = vpop.eup %291 }
 0x21e   :  { %v196_v48 = vmul.f32 %v292_v46, %v180_v32 }
 0x220   :  { %v205_v50 = vmul.f32 %v241_v47, %v196_v48 }
 0x221   :  { %v294_v51 = vpop.eup %293 }
 0x222   :  { %v214_v52 = vadd.f32 %v242_v49, %v205_v50  ;;  %v197_v53 = vmul.f32 %v294_v51, %v181_v36 }
 0x224   :  { %v245_v54 = vpack.c.bf16 %v214_v52, %v214_v52  ;;  %v206_v55 = vmul.f32 %v241_v47, %v197_v53 }
 0x226   :  { %225 = vst.msk [vmem:[%s391_s6] sm:$0xf] %vm224_vm2, %v245_v54  ;;  %v215_v56 = vadd.f32 %v242_v49, %v206_v55 }
 0x228   :  { %v246_v57 = vpack.c.bf16 %v215_v56, %v215_v56 }
 0x22a   :  { %226 = vst.msk [vmem:[%s391_s6 + $0x4] sm:$0xf] %vm224_vm2, %v246_v57 }

</bundles_post_ra>
